<compile_context>
chip_gen: v5e
topology: v5e:2x2
jax: 0.10.0
libtpu: 0.0.40
codegen_flags: <defaults>
</compile_context>

<pallas_src>
import math
from functools import partial

import jax
import jax.numpy as jnp
import numpy as np
from jax.experimental import pallas as pl
from jax.experimental.pallas import tpu as pltpu


# ---------------------------------------------------------------------------
# Fused Pallas kernel (one batch tile per grid step)
# ---------------------------------------------------------------------------
def fused_cnn_kernel(x_ref, m1_ref, cb1_ref, ac1_ref, rp1_ref,
                     m2_ref, cb2_ref, ac2_ref, rp2_ref,
                     wfc1_ref, bfc1_ref, wfc2_ref, bfc2_ref, o_ref):
    """Per grid step (Bt images stacked along rows):

      x_ref   : (1, Bt*H, W*Cin)          f32   NHWC rows, batch-stacked
      m1_ref  : (3, W*Cin, W1*C1)         bf16  conv1 band matrices (scale folded)
      cb1_ref : (1, W1*C1)                f32   conv1 bias row
      ac1_ref : (W1*C1, K1PAD)            bf16  col pool 1 (padded to 128-lane mult)
      rp1_ref : (Bt*H1p, Bt*H-2)          bf16  block-diag row pool 1 (drops boundary rows)
      m2_ref  : (3, K1PAD, W2*C2)         bf16  conv2 band matrices (padded K)
      cb2_ref : (1, W2*C2)                f32   conv2 bias row
      ac2_ref : (W2*C2, W2p*C2)           bf16  col pool 2
      rp2_ref : (H2p, Bt, Bt*H1p-2)       bf16  per-row-group pool-2 selectors
      wfc1_ref: (H2p, W2p*C2, 8*width)    bf16  fc1 weight grouped by pooled row
      bfc1_ref: (1, 8*width)              f32
      wfc2_ref: (8*width, CPAD)           bf16  fc2 weight (classes padded to 128)
      bfc2_ref: (1, CPAD)                 f32
      o_ref   : (1, Bt, CPAD)             f32   logits (padded classes)
    """
    x = x_ref[0]                                           # (Bt*H, W*Cin) f32
    n_rows1 = x.shape[0] - 2                               # batch-stacked conv1 rows
    w1c1 = m1_ref.shape[2]

    # ---- conv1 (+ bias + ReLU): 3 accumulated banded MXU matmuls ----------
    acc1 = jnp.zeros((n_rows1, w1c1), jnp.float32)
    for kh in range(3):
        acc1 = acc1 + jnp.dot(
            x[kh:kh + n_rows1, :].astype(jnp.bfloat16), m1_ref[kh],
            preferred_element_type=jnp.float32)
    y1 = jnp.maximum(acc1 + cb1_ref[...], 0.0)             # boundary rows harmless

    # ---- pool1: column pool (lane-padded) + block-diag row pool -----------
    z1 = jnp.dot(y1.astype(jnp.bfloat16), ac1_ref[...],
                 preferred_element_type=jnp.float32)       # (Bt*H-2, K1PAD)
    p1 = jnp.dot(rp1_ref[...], z1.astype(jnp.bfloat16),
                 preferred_element_type=jnp.float32)       # (Bt*H1p, K1PAD)
    p1b = p1.astype(jnp.bfloat16)

    # ---- conv2 (+ bias + ReLU) --------------------------------------------
    n_rows2 = p1.shape[0] - 2
    w2c2 = m2_ref.shape[2]
    acc2 = jnp.zeros((n_rows2, w2c2), jnp.float32)
    for kh in range(3):
        acc2 = acc2 + jnp.dot(p1b[kh:kh + n_rows2, :], m2_ref[kh],
                              preferred_element_type=jnp.float32)
    y2 = jnp.maximum(acc2 + cb2_ref[...], 0.0)

    # ---- pool2 columns ------------------------------------------------------
    z2 = jnp.dot(y2.astype(jnp.bfloat16), ac2_ref[...],
                 preferred_element_type=jnp.float32)       # (Bt*H1p-2, W2p*C2)
    z2b = z2.astype(jnp.bfloat16)

    # ---- pool2 rows + flatten + fc1 fused (per pooled-row group) ----------
    n_groups = rp2_ref.shape[0]                            # H2p
    bt = o_ref.shape[1]
    hidden = wfc1_ref.shape[2]
    h1 = jnp.zeros((bt, hidden), jnp.float32) + bfc1_ref[...]
    for g in range(n_groups):
        qg = jnp.dot(rp2_ref[g], z2b,
                     preferred_element_type=jnp.float32)   # (Bt, W2p*C2)
        h1 = h1 + jnp.dot(qg.astype(jnp.bfloat16), wfc1_ref[g],
                          preferred_element_type=jnp.float32)
    h1 = jnp.maximum(h1, 0.0)

    # ---- fc2 (FinalLinear, scale folded, classes padded to 128 lanes) -----
    o_ref[0] = jnp.dot(h1.astype(jnp.bfloat16), wfc2_ref[...],
                       preferred_element_type=jnp.float32) + bfc2_ref[...]


# ---------------------------------------------------------------------------
# pallas_call wrapper
# ---------------------------------------------------------------------------
def cnn_forward(x_nchw, pp, *, num_classes, block_batch):
    n, c, h, w = x_nchw.shape
    bt = block_batch
    assert n % bt == 0, "block_batch must divide the batch size"
    g = n // bt
    # TODO(synk): fold this NCHW->NHWC layout change into the kernel's input DMA
    # (or accept NHWC inputs) to avoid an extra XLA pass over x at large batch.
    x = jnp.transpose(x_nchw, (0, 2, 3, 1)).reshape(g, bt * h, w * c)
    cpad = pp["wfc2"].shape[1]

    out = pl.pallas_call(
        fused_cnn_kernel,
        out_shape=jax.ShapeDtypeStruct((g, bt, cpad), jnp.float32),
        grid=(g,),
        in_specs=[
            pl.BlockSpec((1, bt * h, w * c), lambda i: (i, 0, 0)),   # batch tile
            pl.BlockSpec(pp["m1"].shape, lambda i: (0, 0, 0)),       # resident weights
            pl.BlockSpec(pp["cb1"].shape, lambda i: (0, 0)),
            pl.BlockSpec(pp["ac1"].shape, lambda i: (0, 0)),
            pl.BlockSpec(pp["rp1"].shape, lambda i: (0, 0)),
            pl.BlockSpec(pp["m2"].shape, lambda i: (0, 0, 0)),
            pl.BlockSpec(pp["cb2"].shape, lambda i: (0, 0)),
            pl.BlockSpec(pp["ac2"].shape, lambda i: (0, 0)),
            pl.BlockSpec(pp["rp2"].shape, lambda i: (0, 0, 0)),
            pl.BlockSpec(pp["wfc1"].shape, lambda i: (0, 0, 0)),
            pl.BlockSpec(pp["bfc1"].shape, lambda i: (0, 0)),
            pl.BlockSpec(pp["wfc2"].shape, lambda i: (0, 0)),
            pl.BlockSpec(pp["bfc2"].shape, lambda i: (0, 0)),
        ],
        out_specs=pl.BlockSpec((1, bt, cpad), lambda i: (i, 0, 0)),
        compiler_params=pltpu.CompilerParams(
            dimension_semantics=("parallel",)),
    )(x, pp["m1"], pp["cb1"], pp["ac1"], pp["rp1"],
      pp["m2"], pp["cb2"], pp["ac2"], pp["rp2"],
      pp["wfc1"], pp["bfc1"], pp["wfc2"], pp["bfc2"])

    return out.reshape(n, cpad)[:, :num_classes]


def pick_batch_tile(n, h, max_rows=128):
    """Largest divisor Bt of n s.t. the stacked conv rows Bt*H stay <= max_rows
    and (when possible) >= 2 grid blocks remain so v7x can use both TCs."""
    max_bt = max(1, max_rows // h)
    divs = [d for d in range(1, min(n, max_bt) + 1) if n % d == 0]
    multi = [d for d in divs if n // d >= 2]
    return max(multi) if multi else max(divs)


# ---------------------------------------------------------------------------
# Host-side parameter preparation (scale folding, banded conv, pool matrices)
# ---------------------------------------------------------------------------
def conv_band_mats(w_oihw, win, scale):
    """Banded per-kernel-row matrices: conv_out2d[h] = sum_r x2d[h+r] @ m[r]."""
    co, ci, _, _ = np.asarray(w_oihw).shape
    wo = win - 2
    wnp = np.asarray(w_oihw, np.float32) * scale
    m = np.zeros((3, win * ci, wo * co), np.float32)
    for r in range(3):
        for s in range(3):
            blk = wnp[:, :, r, s].T                           # (ci, co)
            for j in range(wo):
                m[r, (j + s) * ci:(j + s + 1) * ci, j * co:(j + 1) * co] = blk
    return m


def col_pool_mat(wo, co, out_pad=None):
    """2:1 average pooling over the W axis of a (., W*co) row layout."""
    wp = wo // 2
    pc = np.zeros((wo, wp), np.float32)
    pc[2 * np.arange(wp), np.arange(wp)] = 0.5
    pc[2 * np.arange(wp) + 1, np.arange(wp)] = 0.5
    ac = np.kron(pc, np.eye(co, dtype=np.float32))            # (wo*co, wp*co)
    if out_pad is not None and out_pad > ac.shape[1]:
        ac = np.pad(ac, ((0, 0), (0, out_pad - ac.shape[1])))
    return ac


def row_pool_mat(bt, h, hp):
    """Block-diag 2:1 row pool over batch-stacked conv rows; drops the
    cross-image boundary rows produced by the stacked conv."""
    n_rows = bt * h - 2
    p = np.zeros((bt * hp, n_rows), np.float32)
    for b in range(bt):
        for r in range(hp):
            p[b * hp + r, b * h + 2 * r] = 0.5
            p[b * hp + r, b * h + 2 * r + 1] = 0.5
    return p


def row_pool_group_mats(bt, h, hp):
    """Per-pooled-row-group selector matrices (fuse pool2-rows with flatten)."""
    n_rows = bt * h - 2
    p = np.zeros((hp, bt, n_rows), np.float32)
    for g in range(hp):
        for b in range(bt):
            p[g, b, b * h + 2 * g] = 0.5
            p[g, b, b * h + 2 * g + 1] = 0.5
    return p


def prepare_pallas_params(pt, H, W, C, width, num_classes, gamma0, block_batch):
    c1, c2 = width, 2 * width
    H1, W1 = H - 2, W - 2
    H1p, W1p = H1 // 2, W1 // 2
    H2, W2 = H1p - 2, W1p - 2
    H2p, W2p = H2 // 2, W2 // 2
    fin = H2p * W2p * c2
    hid = 8 * width
    assert fin == np.asarray(pt["wfc1"]).shape[1], "fc1 in_features mismatch"
    bt = block_batch

    # stage 1
    m1 = conv_band_mats(pt["w1"], W, 1.0 / math.sqrt(C))
    cb1 = np.tile(np.asarray(pt["b1c"], np.float32) / math.sqrt(C), W1)[None, :]
    k1pad = ((W1p * c1 + 127) // 128) * 128                   # 224 -> 256
    ac1 = col_pool_mat(W1, c1, out_pad=k1pad)
    rp1 = row_pool_mat(bt, H, H1p)

    # stage 2 (K padded with zero rows to match the padded pool-1 output)
    m2 = conv_band_mats(pt["w2"], W1p, 1.0 / math.sqrt(c1))
    m2p = np.zeros((3, k1pad, W2 * c2), np.float32)
    m2p[:, :W1p * c1, :] = m2
    cb2 = np.tile(np.asarray(pt["b2c"], np.float32) / math.sqrt(c1), W2)[None, :]
    ac2 = col_pool_mat(W2, c2)
    rp2 = row_pool_group_mats(bt, H1p, H2p)

    # head: fc1 grouped by pooled row (PyTorch (C,H,W)-flatten column order
    # permuted to the kernel's (w2p, c2) per-group layout), fc2 padded to 128.
    wfc1 = np.asarray(pt["wfc1"], np.float32).reshape(hid, c2, H2p, W2p)
    wfc1 = wfc1.transpose(2, 3, 1, 0).reshape(H2p, W2p * c2, hid) / math.sqrt(fin)
    bfc1 = (np.asarray(pt["bfc1"], np.float32) / math.sqrt(fin))[None, :]

    s2 = 1.0 / (hid * gamma0)
    cpad = ((num_classes + 127) // 128) * 128
    wfc2 = np.zeros((hid, cpad), np.float32)
    wfc2[:, :num_classes] = np.asarray(pt["wfc2"], np.float32).T * s2
    bfc2 = np.zeros((1, cpad), np.float32)
    bfc2[0, :num_classes] = np.asarray(pt["bfc2"], np.float32) * s2

    bf, f32 = jnp.bfloat16, jnp.float32
    return {
        "m1": jnp.asarray(m1, bf), "cb1": jnp.asarray(cb1, f32),
        "ac1": jnp.asarray(ac1, bf), "rp1": jnp.asarray(rp1, bf),
        "m2": jnp.asarray(m2p, bf), "cb2": jnp.asarray(cb2, f32),
        "ac2": jnp.asarray(ac2, bf), "rp2": jnp.asarray(rp2, bf),
        "wfc1": jnp.asarray(wfc1, bf), "bfc1": jnp.asarray(bfc1, f32),
        "wfc2": jnp.asarray(wfc2, bf), "bfc2": jnp.asarray(bfc2, f32),
    }


def make_params(key, H, W, C, width, num_classes):
    """PyTorch-layout params of a freshly constructed CNN: N(0,1) weights, zero bias."""
    k1, k2, k3, k4 = jax.random.split(key, 4)
    fc1_in = (H // 4 - 2) * (W // 4 - 2) * 2 * width
    return {
        "w1": jax.random.normal(k1, (width, C, 3, 3), jnp.float32),
        "b1c": jnp.zeros((width,), jnp.float32),
        "w2": jax.random.normal(k2, (2 * width, width, 3, 3), jnp.float32),
        "b2c": jnp.zeros((2 * width,), jnp.float32),
        "wfc1": jax.random.normal(k3, (8 * width, fc1_in), jnp.float32),
        "bfc1": jnp.zeros((8 * width,), jnp.float32),
        "wfc2": jax.random.normal(k4, (num_classes, 8 * width), jnp.float32),
        "bfc2": jnp.zeros((num_classes,), jnp.float32),
    }


# ---------------------------------------------------------------------------
# Pure-JAX reference mirroring the PyTorch forward (f32, HIGHEST precision)
# ---------------------------------------------------------------------------
def ref_forward(x, pt, *, gamma0):
    hi = jax.lax.Precision.HIGHEST

    def stdconv(h, w_oihw, b):
        scale = 1.0 / math.sqrt(h.shape[1])
        y = jax.lax.conv_general_dilated(
            h, w_oihw, (1, 1), [(0, 0), (0, 0)],
            dimension_numbers=("NCHW", "OIHW", "NCHW"), precision=hi)
        return (y + b[None, :, None, None]) * scale

    def avgpool2(h):
        n, c, hh, ww = h.shape
        hp, wp = hh // 2, ww // 2
        h = h[:, :, :hp * 2, :wp * 2].reshape(n, c, hp, 2, wp, 2)
        return h.mean(axis=(3, 5))

    out = jax.nn.relu(stdconv(x, pt["w1"], pt["b1c"]))
    out = avgpool2(out)
    out = jax.nn.relu(stdconv(out, pt["w2"], pt["b2c"]))
    out = avgpool2(out)
    flat = out.reshape(out.shape[0], -1)             # torch.flatten(x, 1) order
    h1 = jnp.dot(flat, pt["wfc1"].T, precision=hi) + pt["bfc1"]
    h1 = jax.nn.relu(h1 / math.sqrt(flat.shape[1]))
    o = (jnp.dot(h1, pt["wfc2"].T, precision=hi) + pt["bfc2"]) / h1.shape[-1]
    return o / gamma0


# ---------------------------------------------------------------------------
if __name__ == "__main__":
    N, C, H, W = 2, 4, 16, 16
    width, num_classes, gamma0 = 32, 10, 1.0

    key = jax.random.PRNGKey(0)
    kx, kp = jax.random.split(key)
    x = jax.random.normal(kx, (N, C, H, W), jnp.float32)    # NCHW, like PyTorch

    pt = make_params(kp, H, W, C, width, num_classes)
    bt = pick_batch_tile(N, H)                              # N=2 -> Bt=1, grid=(2,)
    pp = prepare_pallas_params(pt, H, W, C, width, num_classes, gamma0, bt)

    fwd = jax.jit(partial(cnn_forward, num_classes=num_classes, block_batch=bt))
    out = jax.block_until_ready(fwd(x, pp))

    ref = jax.block_until_ready(ref_forward(x, pt, gamma0=gamma0))

    # Tolerance accounts for single-pass bf16 MXU matmuls vs the f32 reference.
    np.testing.assert_allclose(np.asarray(out), np.asarray(ref),
                               rtol=5e-2, atol=1e-2)
    print("KERNEL_OK")
</pallas_src>

<mosaic_0001>
module attributes {stable_mosaic.version = 11 : i64} {
  func.func @fused_cnn_kernel(%arg0: i32, %arg1: memref<1x16x64xf32, #tpu.memory_space<vmem>>, %arg2: memref<3x64x448xbf16, #tpu.memory_space<vmem>>, %arg3: memref<1x448xf32, #tpu.memory_space<vmem>>, %arg4: memref<448x256xbf16, #tpu.memory_space<vmem>>, %arg5: memref<7x14xbf16, #tpu.memory_space<vmem>>, %arg6: memref<3x256x320xbf16, #tpu.memory_space<vmem>>, %arg7: memref<1x320xf32, #tpu.memory_space<vmem>>, %arg8: memref<320x128xbf16, #tpu.memory_space<vmem>>, %arg9: memref<2x1x5xbf16, #tpu.memory_space<vmem>>, %arg10: memref<2x128x256xbf16, #tpu.memory_space<vmem>>, %arg11: memref<1x256xf32, #tpu.memory_space<vmem>>, %arg12: memref<256x128xbf16, #tpu.memory_space<vmem>>, %arg13: memref<1x128xf32, #tpu.memory_space<vmem>>, %arg14: memref<1x1x128xf32, #tpu.memory_space<vmem>>) attributes {dimension_semantics = [#tpu.dimension_semantics<parallel>], iteration_bounds = array<i64: 2>, scalar_prefetch = 0 : i64, scratch_operands = 0 : i64, tpu.core_type = #tpu.core_type<tc>, window_params = [{transform_indices = @transform_0, window_bounds = array<i64: 1, 16, 64>}, {pipeline_mode = #tpu.pipeline_mode<synchronous>, transform_indices = @transform_1, window_bounds = array<i64: 3, 64, 448>}, {pipeline_mode = #tpu.pipeline_mode<synchronous>, transform_indices = @transform_2, window_bounds = array<i64: 1, 448>}, {pipeline_mode = #tpu.pipeline_mode<synchronous>, transform_indices = @transform_3, window_bounds = array<i64: 448, 256>}, {pipeline_mode = #tpu.pipeline_mode<synchronous>, transform_indices = @transform_4, window_bounds = array<i64: 7, 14>}, {pipeline_mode = #tpu.pipeline_mode<synchronous>, transform_indices = @transform_5, window_bounds = array<i64: 3, 256, 320>}, {pipeline_mode = #tpu.pipeline_mode<synchronous>, transform_indices = @transform_6, window_bounds = array<i64: 1, 320>}, {pipeline_mode = #tpu.pipeline_mode<synchronous>, transform_indices = @transform_7, window_bounds = array<i64: 320, 128>}, {pipeline_mode = #tpu.pipeline_mode<synchronous>, transform_indices = @transform_8, window_bounds = array<i64: 2, 1, 5>}, {pipeline_mode = #tpu.pipeline_mode<synchronous>, transform_indices = @transform_9, window_bounds = array<i64: 2, 128, 256>}, {pipeline_mode = #tpu.pipeline_mode<synchronous>, transform_indices = @transform_10, window_bounds = array<i64: 1, 256>}, {pipeline_mode = #tpu.pipeline_mode<synchronous>, transform_indices = @transform_11, window_bounds = array<i64: 256, 128>}, {pipeline_mode = #tpu.pipeline_mode<synchronous>, transform_indices = @transform_12, window_bounds = array<i64: 1, 128>}, {transform_indices = @transform_13, window_bounds = array<i64: 1, 1, 128>}]} {
    %c0 = arith.constant 0 : index
    %c0_0 = arith.constant 0 : index
    %c0_1 = arith.constant 0 : index
    %0 = vector.load %arg1[%c0, %c0_0, %c0_1] : memref<1x16x64xf32, #tpu.memory_space<vmem>>, vector<1x16x64xf32>
    %1 = vector.shape_cast %0 : vector<1x16x64xf32> to vector<16x64xf32>
    %cst = arith.constant 0.000000e+00 : f32
    %2 = vector.broadcast %cst : f32 to vector<14x448xf32>
    %3 = vector.extract_strided_slice %1 {offsets = [0, 0], sizes = [14, 64], strides = [1, 1]} : vector<16x64xf32> to vector<14x64xf32>
    %4 = arith.truncf %3 : vector<14x64xf32> to vector<14x64xbf16>
    %c0_2 = arith.constant 0 : index
    %c0_3 = arith.constant 0 : index
    %c0_4 = arith.constant 0 : index
    %5 = vector.load %arg2[%c0_2, %c0_3, %c0_4] : memref<3x64x448xbf16, #tpu.memory_space<vmem>>, vector<1x64x448xbf16>
    %6 = vector.shape_cast %5 : vector<1x64x448xbf16> to vector<64x448xbf16>
    %cst_5 = arith.constant dense<0.000000e+00> : vector<14x448xf32>
    %7 = tpu.matmul %4, %6, %cst_5 {dimension_numbers = #tpu.dot_dimension_numbers<[1], [0], [0], [1], [0, 0, 1, 1], [], []>} : vector<14x64xbf16>, vector<64x448xbf16>, vector<14x448xf32> -> vector<14x448xf32>
    %8 = arith.addf %2, %7 : vector<14x448xf32>
    %9 = vector.extract_strided_slice %1 {offsets = [1, 0], sizes = [14, 64], strides = [1, 1]} : vector<16x64xf32> to vector<14x64xf32>
    %10 = arith.truncf %9 : vector<14x64xf32> to vector<14x64xbf16>
    %c1 = arith.constant 1 : index
    %c0_6 = arith.constant 0 : index
    %c0_7 = arith.constant 0 : index
    %11 = vector.load %arg2[%c1, %c0_6, %c0_7] : memref<3x64x448xbf16, #tpu.memory_space<vmem>>, vector<1x64x448xbf16>
    %12 = vector.shape_cast %11 : vector<1x64x448xbf16> to vector<64x448xbf16>
    %cst_8 = arith.constant dense<0.000000e+00> : vector<14x448xf32>
    %13 = tpu.matmul %10, %12, %cst_8 {dimension_numbers = #tpu.dot_dimension_numbers<[1], [0], [0], [1], [0, 0, 1, 1], [], []>} : vector<14x64xbf16>, vector<64x448xbf16>, vector<14x448xf32> -> vector<14x448xf32>
    %14 = arith.addf %8, %13 : vector<14x448xf32>
    %15 = vector.extract_strided_slice %1 {offsets = [2, 0], sizes = [14, 64], strides = [1, 1]} : vector<16x64xf32> to vector<14x64xf32>
    %16 = arith.truncf %15 : vector<14x64xf32> to vector<14x64xbf16>
    %c2 = arith.constant 2 : index
    %c0_9 = arith.constant 0 : index
    %c0_10 = arith.constant 0 : index
    %17 = vector.load %arg2[%c2, %c0_9, %c0_10] : memref<3x64x448xbf16, #tpu.memory_space<vmem>>, vector<1x64x448xbf16>
    %18 = vector.shape_cast %17 : vector<1x64x448xbf16> to vector<64x448xbf16>
    %cst_11 = arith.constant dense<0.000000e+00> : vector<14x448xf32>
    %19 = tpu.matmul %16, %18, %cst_11 {dimension_numbers = #tpu.dot_dimension_numbers<[1], [0], [0], [1], [0, 0, 1, 1], [], []>} : vector<14x64xbf16>, vector<64x448xbf16>, vector<14x448xf32> -> vector<14x448xf32>
    %20 = arith.addf %14, %19 : vector<14x448xf32>
    %c0_12 = arith.constant 0 : index
    %c0_13 = arith.constant 0 : index
    %21 = vector.load %arg3[%c0_12, %c0_13] : memref<1x448xf32, #tpu.memory_space<vmem>>, vector<1x448xf32>
    %22 = vector.broadcast %21 : vector<1x448xf32> to vector<14x448xf32>
    %23 = arith.addf %20, %22 : vector<14x448xf32>
    %cst_14 = arith.constant 0.000000e+00 : f32
    %24 = vector.broadcast %cst_14 : f32 to vector<14x448xf32>
    %25 = arith.maximumf %23, %24 : vector<14x448xf32>
    %26 = arith.truncf %25 : vector<14x448xf32> to vector<14x448xbf16>
    %c0_15 = arith.constant 0 : index
    %c0_16 = arith.constant 0 : index
    %27 = vector.load %arg4[%c0_15, %c0_16] : memref<448x256xbf16, #tpu.memory_space<vmem>>, vector<448x256xbf16>
    %cst_17 = arith.constant dense<0.000000e+00> : vector<14x256xf32>
    %28 = tpu.matmul %26, %27, %cst_17 {dimension_numbers = #tpu.dot_dimension_numbers<[1], [0], [0], [1], [0, 0, 1, 1], [], []>} : vector<14x448xbf16>, vector<448x256xbf16>, vector<14x256xf32> -> vector<14x256xf32>
    %c0_18 = arith.constant 0 : index
    %c0_19 = arith.constant 0 : index
    %29 = vector.load %arg5[%c0_18, %c0_19] : memref<7x14xbf16, #tpu.memory_space<vmem>>, vector<7x14xbf16>
    %30 = arith.truncf %28 : vector<14x256xf32> to vector<14x256xbf16>
    %cst_20 = arith.constant dense<0.000000e+00> : vector<7x256xf32>
    %31 = tpu.matmul %29, %30, %cst_20 {dimension_numbers = #tpu.dot_dimension_numbers<[1], [0], [0], [1], [0, 0, 1, 1], [], []>} : vector<7x14xbf16>, vector<14x256xbf16>, vector<7x256xf32> -> vector<7x256xf32>
    %32 = arith.truncf %31 : vector<7x256xf32> to vector<7x256xbf16>
    %cst_21 = arith.constant 0.000000e+00 : f32
    %33 = vector.broadcast %cst_21 : f32 to vector<5x320xf32>
    %34 = vector.extract_strided_slice %32 {offsets = [0, 0], sizes = [5, 256], strides = [1, 1]} : vector<7x256xbf16> to vector<5x256xbf16>
    %c0_22 = arith.constant 0 : index
    %c0_23 = arith.constant 0 : index
    %c0_24 = arith.constant 0 : index
    %35 = vector.load %arg6[%c0_22, %c0_23, %c0_24] : memref<3x256x320xbf16, #tpu.memory_space<vmem>>, vector<1x256x320xbf16>
    %36 = vector.shape_cast %35 : vector<1x256x320xbf16> to vector<256x320xbf16>
    %cst_25 = arith.constant dense<0.000000e+00> : vector<5x320xf32>
    %37 = tpu.matmul %34, %36, %cst_25 {dimension_numbers = #tpu.dot_dimension_numbers<[1], [0], [0], [1], [0, 0, 1, 1], [], []>} : vector<5x256xbf16>, vector<256x320xbf16>, vector<5x320xf32> -> vector<5x320xf32>
    %38 = arith.addf %33, %37 : vector<5x320xf32>
    %39 = vector.extract_strided_slice %32 {offsets = [1, 0], sizes = [5, 256], strides = [1, 1]} : vector<7x256xbf16> to vector<5x256xbf16>
    %c1_26 = arith.constant 1 : index
    %c0_27 = arith.constant 0 : index
    %c0_28 = arith.constant 0 : index
    %40 = vector.load %arg6[%c1_26, %c0_27, %c0_28] : memref<3x256x320xbf16, #tpu.memory_space<vmem>>, vector<1x256x320xbf16>
    %41 = vector.shape_cast %40 : vector<1x256x320xbf16> to vector<256x320xbf16>
    %cst_29 = arith.constant dense<0.000000e+00> : vector<5x320xf32>
    %42 = tpu.matmul %39, %41, %cst_29 {dimension_numbers = #tpu.dot_dimension_numbers<[1], [0], [0], [1], [0, 0, 1, 1], [], []>} : vector<5x256xbf16>, vector<256x320xbf16>, vector<5x320xf32> -> vector<5x320xf32>
    %43 = arith.addf %38, %42 : vector<5x320xf32>
    %44 = vector.extract_strided_slice %32 {offsets = [2, 0], sizes = [5, 256], strides = [1, 1]} : vector<7x256xbf16> to vector<5x256xbf16>
    %c2_30 = arith.constant 2 : index
    %c0_31 = arith.constant 0 : index
    %c0_32 = arith.constant 0 : index
    %45 = vector.load %arg6[%c2_30, %c0_31, %c0_32] : memref<3x256x320xbf16, #tpu.memory_space<vmem>>, vector<1x256x320xbf16>
    %46 = vector.shape_cast %45 : vector<1x256x320xbf16> to vector<256x320xbf16>
    %cst_33 = arith.constant dense<0.000000e+00> : vector<5x320xf32>
    %47 = tpu.matmul %44, %46, %cst_33 {dimension_numbers = #tpu.dot_dimension_numbers<[1], [0], [0], [1], [0, 0, 1, 1], [], []>} : vector<5x256xbf16>, vector<256x320xbf16>, vector<5x320xf32> -> vector<5x320xf32>
    %48 = arith.addf %43, %47 : vector<5x320xf32>
    %c0_34 = arith.constant 0 : index
    %c0_35 = arith.constant 0 : index
    %49 = vector.load %arg7[%c0_34, %c0_35] : memref<1x320xf32, #tpu.memory_space<vmem>>, vector<1x320xf32>
    %50 = vector.broadcast %49 : vector<1x320xf32> to vector<5x320xf32>
    %51 = arith.addf %48, %50 : vector<5x320xf32>
    %cst_36 = arith.constant 0.000000e+00 : f32
    %52 = vector.broadcast %cst_36 : f32 to vector<5x320xf32>
    %53 = arith.maximumf %51, %52 : vector<5x320xf32>
    %54 = arith.truncf %53 : vector<5x320xf32> to vector<5x320xbf16>
    %c0_37 = arith.constant 0 : index
    %c0_38 = arith.constant 0 : index
    %55 = vector.load %arg8[%c0_37, %c0_38] : memref<320x128xbf16, #tpu.memory_space<vmem>>, vector<320x128xbf16>
    %cst_39 = arith.constant dense<0.000000e+00> : vector<5x128xf32>
    %56 = tpu.matmul %54, %55, %cst_39 {dimension_numbers = #tpu.dot_dimension_numbers<[1], [0], [0], [1], [0, 0, 1, 1], [], []>} : vector<5x320xbf16>, vector<320x128xbf16>, vector<5x128xf32> -> vector<5x128xf32>
    %57 = arith.truncf %56 : vector<5x128xf32> to vector<5x128xbf16>
    %cst_40 = arith.constant 0.000000e+00 : f32
    %58 = vector.broadcast %cst_40 : f32 to vector<1x256xf32>
    %c0_41 = arith.constant 0 : index
    %c0_42 = arith.constant 0 : index
    %59 = vector.load %arg11[%c0_41, %c0_42] : memref<1x256xf32, #tpu.memory_space<vmem>>, vector<1x256xf32>
    %60 = arith.addf %58, %59 : vector<1x256xf32>
    %c0_43 = arith.constant 0 : index
    %c0_44 = arith.constant 0 : index
    %c0_45 = arith.constant 0 : index
    %61 = vector.load %arg9[%c0_43, %c0_44, %c0_45] : memref<2x1x5xbf16, #tpu.memory_space<vmem>>, vector<1x1x5xbf16>
    %62 = vector.shape_cast %61 : vector<1x1x5xbf16> to vector<1x5xbf16>
    %cst_46 = arith.constant dense<0.000000e+00> : vector<1x128xf32>
    %63 = tpu.matmul %62, %57, %cst_46 {dimension_numbers = #tpu.dot_dimension_numbers<[1], [0], [0], [1], [0, 0, 1, 1], [], []>} : vector<1x5xbf16>, vector<5x128xbf16>, vector<1x128xf32> -> vector<1x128xf32>
    %64 = arith.truncf %63 : vector<1x128xf32> to vector<1x128xbf16>
    %c0_47 = arith.constant 0 : index
    %c0_48 = arith.constant 0 : index
    %c0_49 = arith.constant 0 : index
    %65 = vector.load %arg10[%c0_47, %c0_48, %c0_49] : memref<2x128x256xbf16, #tpu.memory_space<vmem>>, vector<1x128x256xbf16>
    %66 = vector.shape_cast %65 : vector<1x128x256xbf16> to vector<128x256xbf16>
    %cst_50 = arith.constant dense<0.000000e+00> : vector<1x256xf32>
    %67 = tpu.matmul %64, %66, %cst_50 {dimension_numbers = #tpu.dot_dimension_numbers<[1], [0], [0], [1], [0, 0, 1, 1], [], []>} : vector<1x128xbf16>, vector<128x256xbf16>, vector<1x256xf32> -> vector<1x256xf32>
    %68 = arith.addf %60, %67 : vector<1x256xf32>
    %c1_51 = arith.constant 1 : index
    %c0_52 = arith.constant 0 : index
    %c0_53 = arith.constant 0 : index
    %69 = vector.load %arg9[%c1_51, %c0_52, %c0_53] : memref<2x1x5xbf16, #tpu.memory_space<vmem>>, vector<1x1x5xbf16>
    %70 = vector.shape_cast %69 : vector<1x1x5xbf16> to vector<1x5xbf16>
    %cst_54 = arith.constant dense<0.000000e+00> : vector<1x128xf32>
    %71 = tpu.matmul %70, %57, %cst_54 {dimension_numbers = #tpu.dot_dimension_numbers<[1], [0], [0], [1], [0, 0, 1, 1], [], []>} : vector<1x5xbf16>, vector<5x128xbf16>, vector<1x128xf32> -> vector<1x128xf32>
    %72 = arith.truncf %71 : vector<1x128xf32> to vector<1x128xbf16>
    %c1_55 = arith.constant 1 : index
    %c0_56 = arith.constant 0 : index
    %c0_57 = arith.constant 0 : index
    %73 = vector.load %arg10[%c1_55, %c0_56, %c0_57] : memref<2x128x256xbf16, #tpu.memory_space<vmem>>, vector<1x128x256xbf16>
    %74 = vector.shape_cast %73 : vector<1x128x256xbf16> to vector<128x256xbf16>
    %cst_58 = arith.constant dense<0.000000e+00> : vector<1x256xf32>
    %75 = tpu.matmul %72, %74, %cst_58 {dimension_numbers = #tpu.dot_dimension_numbers<[1], [0], [0], [1], [0, 0, 1, 1], [], []>} : vector<1x128xbf16>, vector<128x256xbf16>, vector<1x256xf32> -> vector<1x256xf32>
    %76 = arith.addf %68, %75 : vector<1x256xf32>
    %cst_59 = arith.constant 0.000000e+00 : f32
    %77 = vector.broadcast %cst_59 : f32 to vector<1x256xf32>
    %78 = arith.maximumf %76, %77 : vector<1x256xf32>
    %79 = arith.truncf %78 : vector<1x256xf32> to vector<1x256xbf16>
    %c0_60 = arith.constant 0 : index
    %c0_61 = arith.constant 0 : index
    %80 = vector.load %arg12[%c0_60, %c0_61] : memref<256x128xbf16, #tpu.memory_space<vmem>>, vector<256x128xbf16>
    %cst_62 = arith.constant dense<0.000000e+00> : vector<1x128xf32>
    %81 = tpu.matmul %79, %80, %cst_62 {dimension_numbers = #tpu.dot_dimension_numbers<[1], [0], [0], [1], [0, 0, 1, 1], [], []>} : vector<1x256xbf16>, vector<256x128xbf16>, vector<1x128xf32> -> vector<1x128xf32>
    %c0_63 = arith.constant 0 : index
    %c0_64 = arith.constant 0 : index
    %82 = vector.load %arg13[%c0_63, %c0_64] : memref<1x128xf32, #tpu.memory_space<vmem>>, vector<1x128xf32>
    %83 = arith.addf %81, %82 : vector<1x128xf32>
    %c0_65 = arith.constant 0 : index
    %c0_66 = arith.constant 0 : index
    %c0_67 = arith.constant 0 : index
    %84 = vector.load %arg14[%c0_65, %c0_66, %c0_67] : memref<1x1x128xf32, #tpu.memory_space<vmem>>, vector<1x1x128xf32>
    %85 = vector.shape_cast %84 : vector<1x1x128xf32> to vector<1x128xf32>
    %86 = vector.shape_cast %83 : vector<1x128xf32> to vector<1x1x128xf32>
    tpu.vector_store %arg14[%c0_65, %c0_66, %c0_67], %86 {strides = array<i32>} : memref<1x1x128xf32, #tpu.memory_space<vmem>>, vector<1x1x128xf32>,
    return
  }
  func.func @transform_0(%arg0: i32) -> (i32, i32, i32) {
    %c0_i32 = arith.constant 0 : i32
    %c0_i32_0 = arith.constant 0 : i32
    %c0_i32_1 = arith.constant 0 : i32
    return %arg0, %c0_i32, %c0_i32_0 : i32, i32, i32
  }
  func.func @transform_1(%arg0: i32) -> (i32, i32, i32) {
    %c0_i32 = arith.constant 0 : i32
    %c0_i32_0 = arith.constant 0 : i32
    %c0_i32_1 = arith.constant 0 : i32
    %c0_i32_2 = arith.constant 0 : i32
    return %c0_i32, %c0_i32_0, %c0_i32_1 : i32, i32, i32
  }
  func.func @transform_2(%arg0: i32) -> (i32, i32) {
    %c0_i32 = arith.constant 0 : i32
    %c0_i32_0 = arith.constant 0 : i32
    %c0_i32_1 = arith.constant 0 : i32
    return %c0_i32, %c0_i32_0 : i32, i32
  }
  func.func @transform_3(%arg0: i32) -> (i32, i32) {
    %c0_i32 = arith.constant 0 : i32
    %c0_i32_0 = arith.constant 0 : i32
    %c0_i32_1 = arith.constant 0 : i32
    return %c0_i32, %c0_i32_0 : i32, i32
  }
  func.func @transform_4(%arg0: i32) -> (i32, i32) {
    %c0_i32 = arith.constant 0 : i32
    %c0_i32_0 = arith.constant 0 : i32
    %c0_i32_1 = arith.constant 0 : i32
    return %c0_i32, %c0_i32_0 : i32, i32
  }
  func.func @transform_5(%arg0: i32) -> (i32, i32, i32) {
    %c0_i32 = arith.constant 0 : i32
    %c0_i32_0 = arith.constant 0 : i32
    %c0_i32_1 = arith.constant 0 : i32
    %c0_i32_2 = arith.constant 0 : i32
    return %c0_i32, %c0_i32_0, %c0_i32_1 : i32, i32, i32
  }
  func.func @transform_6(%arg0: i32) -> (i32, i32) {
    %c0_i32 = arith.constant 0 : i32
    %c0_i32_0 = arith.constant 0 : i32
    %c0_i32_1 = arith.constant 0 : i32
    return %c0_i32, %c0_i32_0 : i32, i32
  }
  func.func @transform_7(%arg0: i32) -> (i32, i32) {
    %c0_i32 = arith.constant 0 : i32
    %c0_i32_0 = arith.constant 0 : i32
    %c0_i32_1 = arith.constant 0 : i32
    return %c0_i32, %c0_i32_0 : i32, i32
  }
  func.func @transform_8(%arg0: i32) -> (i32, i32, i32) {
    %c0_i32 = arith.constant 0 : i32
    %c0_i32_0 = arith.constant 0 : i32
    %c0_i32_1 = arith.constant 0 : i32
    %c0_i32_2 = arith.constant 0 : i32
    return %c0_i32, %c0_i32_0, %c0_i32_1 : i32, i32, i32
  }
  func.func @transform_9(%arg0: i32) -> (i32, i32, i32) {
    %c0_i32 = arith.constant 0 : i32
    %c0_i32_0 = arith.constant 0 : i32
    %c0_i32_1 = arith.constant 0 : i32
    %c0_i32_2 = arith.constant 0 : i32
    return %c0_i32, %c0_i32_0, %c0_i32_1 : i32, i32, i32
  }
  func.func @transform_10(%arg0: i32) -> (i32, i32) {
    %c0_i32 = arith.constant 0 : i32
    %c0_i32_0 = arith.constant 0 : i32
    %c0_i32_1 = arith.constant 0 : i32
    return %c0_i32, %c0_i32_0 : i32, i32
  }
  func.func @transform_11(%arg0: i32) -> (i32, i32) {
    %c0_i32 = arith.constant 0 : i32
    %c0_i32_0 = arith.constant 0 : i32
    %c0_i32_1 = arith.constant 0 : i32
    return %c0_i32, %c0_i32_0 : i32, i32
  }
  func.func @transform_12(%arg0: i32) -> (i32, i32) {
    %c0_i32 = arith.constant 0 : i32
    %c0_i32_0 = arith.constant 0 : i32
    %c0_i32_1 = arith.constant 0 : i32
    return %c0_i32, %c0_i32_0 : i32, i32
  }
  func.func @transform_13(%arg0: i32) -> (i32, i32, i32) {
    %c0_i32 = arith.constant 0 : i32
    %c0_i32_0 = arith.constant 0 : i32
    %c0_i32_1 = arith.constant 0 : i32
    return %arg0, %c0_i32, %c0_i32_0 : i32, i32, i32
  }
}

</mosaic_0001>

<bundles_post_ra>
// kernel: cnn_forward.1
= control target key start
LH: loop header
LB: loop body
LE: loop exit
PB: predicated region body
PF: predicated region fallthrough
CT: control target
= control target key end

     0   :  { %18 = vsyncpa [#allocation3], 0  ;;  %s7388_s0 = inlined_call_operand.vmem [shape: f32[2,16,64], index: 0, kind: input, shape index: {}]   ;;  %s7389_s1 = inlined_call_operand.vmem [shape: bf16[3,64,448], index: 1, kind: input, shape index: {}]   ;;  %s7390_s2 = inlined_call_operand.vmem [shape: f32[1,448], index: 2, kind: input, shape index: {}]   ;;  %s7391_s3 = inlined_call_operand.vmem [shape: bf16[448,256], index: 3, kind: input, shape index: {}]   ;;  %s7392_s4 = inlined_call_operand.vmem [shape: bf16[7,14], index: 4, kind: input, shape index: {}]   ;;  %s7393_s5 = inlined_call_operand.vmem [shape: bf16[3,256,320], index: 5, kind: input, shape index: {}]   ;;  %s7394_s6 = inlined_call_operand.vmem [shape: f32[1,320], index: 6, kind: input, shape index: {}]   ;;  %s7395_s7 = inlined_call_operand.vmem [shape: bf16[320,128], index: 7, kind: input, shape index: {}]   ;;  %s7396_s8 = inlined_call_operand.vmem [shape: bf16[2,1,5], index: 8, kind: input, shape index: {}]   ;;  %s7397_s9 = inlined_call_operand.vmem [shape: bf16[2,128,256], index: 9, kind: input, shape index: {}]   ;;  %s7398_s10 = inlined_call_operand.vmem [shape: f32[1,256], index: 10, kind: input, shape index: {}]   ;;  %s7399_s11 = inlined_call_operand.vmem [shape: bf16[256,128], index: 11, kind: input, shape index: {}]   ;;  %s7400_s12 = inlined_call_operand.vmem [shape: f32[1,128], index: 12, kind: input, shape index: {}]   ;;  %s7401_s13 = inlined_call_operand.hbm [shape: f32[2,1,128], index: 13, kind: output, shape index: {}]  }
   0x1   :  { %20 = vsyncpa [#allocation3 + $0x1], 0  ;;  %s5391_s25 = smov 0   ;;  %s5393_s26 = smov 0  }
   0x2   :  { %s5395_s27 = smov 0   ;;  %s5397_s28 = smov 0  }
   0x3 LB: > { %7406 = sst [smem:[#allocation5_spill]] %s5314_s27  ;;  %s5412_s29 = sadd.s32 4294967295, %s5318_s28   ;;  %s5318_s28 = sphi %s5397_s28, %s7413_s28   ;;  %s5314_s27 = sphi %s5395_s27, %s7415_s27   ;;  %s5310_s26 = sphi %s5393_s26, %s7417_s26   ;;  %s5306_s25 = sphi %s5391_s25, %s7416_s25  }
   0x4   : > { %s3431_s30 = sadd.s32 4294967294, %s5318_s28   ;;  %s5416_s14 = sadd.s32 1, %s5318_s28  }
   0x5   : > { %7407 = sst [smem:[#allocation6_spill]] %s5416_s14  ;;  %s311_s15 = sadd.s32 1, %s5314_s27 }
   0x6   : > { %s308_s16 = ssub.s32 %s5318_s28, %s5416_s14  ;;  %p321_p0 = scmp.ne.s32.totalorder %s5314_s27, %s5310_s26 }
   0x7   : > { %p309_p1 = scmp.eq.s32.totalorder %s308_s16, 0  ;;  %p322_p2 = scmp.eq.s32.totalorder %s5412_s29, 1 }
   0x8   : > { %p327_p3 = scmp.ne.s32.totalorder %s5310_s26, %s5306_s25  ;;  %p328_p4 = scmp.eq.s32.totalorder %s3431_s30, 1 }
   0x9   : > { %s5427_s17 = scalar_select %p309_p1, %s5314_s27, %s311_s15  }
   0xa   : > { %p5429_p5 = por %p322_p2, %p321_p0  ;;  %p5433_p6 = por %p328_p4, %p327_p3 }
   0xb   : > { %7408 = sst [smem:[#allocation7_spill]] %s5427_s17  ;;  %p3434_p7 = scmp.ge.s32.totalorder %s5318_s28, 1 }
   0xc   : > { %s7410_s19 = scalar_select %p5433_p6, 1, 0 }
   0xd   : > { %p390_p8 = scmp.lt.s32.totalorder %s5318_s28, 3 }
   0xe   : > { %7411 = sst [smem:[#allocation8_spill]] %s7410_s19 }
   0xf   : > { %p391_p9 = pnand %p3434_p7, %p390_p8 }
  0x10   : > { %p433_p10 = scmp.lt.s32.totalorder (!%p391_p9), %s5412_s29, 1  ;;  %s431_s15 = sand.u32 (!%p391_p9), 1, %s5310_s26  }
  0x11   : > { %394 = sbr.rel (%p391_p9) target bundleno = 1322 (0x52a), region = 72  ;;  %s3372_s17 = scalar_lea.hbm (!%p391_p9), %s7401_s13, %s5412_s29 }
  0x12   : > { %s432_s16 = scalar_lea.vmem (!%p391_p9), [#allocation2], %s431_s15  ;;  %s3364_s22 = scalar_lea.sflag (!%p391_p9), [#allocation3], %s431_s15 }
  0x13   : > { %s3374_s21 = sshll.u32 (!%p391_p9), %s432_s16, 4  ;;  %s5276_s19 = scalar_lea.hbm (!%p391_p9), %s7401_s13, 2  ;;  %s3375_s21 = int_to_ptr.vmem [resolvable:$true] %s3374_s21 }
  0x16   : > { %v3503_v0 = vld [vmem:[%s7389_s1 + $0xe0] sm:$0xf]  ;;  %v4930_v1 = vld [vmem:[%s7389_s1 + $0xec] sm:$0xf0]  ;;  %v4928_v2 = vld [vmem:[%s7389_s1 + $0xe4] sm:$0xf] }
  0x17   : > { %v3504_v3 = vor.u32 %v4930_v1, %v3503_v0  ;;  %v3505_v4 = vld [vmem:[%s7389_s1 + $0xf0] sm:$0xf0]  ;;  %v3511_v5 = vld [vmem:[%s7389_s1 + $0xe8] sm:$0xf]  ;;  %v4931_v6 = vld [vmem:[%s7389_s1 + $0xf4] sm:$0xf0] }
  0x18   : > { %v3508_v7 = vor.u32 %v4928_v2, %v3505_v4  ;;  %v3512_v8 = vor.u32 %v4931_v6, %v3511_v5  ;;  %v4929_v9 = vld [vmem:[%s7389_s1 + $0xec] sm:$0xf]  ;;  %v3513_v10 = vld [vmem:[%s7389_s1 + $0xf8] sm:$0xf0]  ;;  %v3487_v11 = vld [vmem:[%s7389_s1 + $0xc0] sm:$0xf] }
  0x19   : > { %570 = vmatpush.bf16.msra.mxu0 %v3504_v3  ;;  %v3516_v12 = vor.u32 %v4929_v9, %v3513_v10  ;;  %v4926_v13 = vld [vmem:[%s7389_s1 + $0xcc] sm:$0xf0]  ;;  %v4924_v14 = vld [vmem:[%s7389_s1 + $0xc4] sm:$0xf]  ;;  %v3489_v15 = vld [vmem:[%s7389_s1 + $0xd0] sm:$0xf0] }
  0x1a   : > { %584 = vmatpush.bf16.msra.mxu1 %v3508_v7  ;;  %598 = vmatpush.bf16.msra.mxu2 %v3512_v8  ;;  %v3488_v16 = vor.u32 %v4926_v13, %v3487_v11  ;;  %v3492_v17 = vor.u32 %v4924_v14, %v3489_v15  ;;  %v3495_v18 = vld [vmem:[%s7389_s1 + $0xc8] sm:$0xf]  ;;  %v4927_v19 = vld [vmem:[%s7389_s1 + $0xd4] sm:$0xf0]  ;;  %v4925_v20 = vld [vmem:[%s7389_s1 + $0xcc] sm:$0xf] }
  0x1b   : > { %612 = vmatpush.bf16.msra.mxu3 %v3516_v12  ;;  %v3496_v21 = vor.u32 %v4927_v19, %v3495_v18  ;;  %v3497_v22 = vld [vmem:[%s7389_s1 + $0xd8] sm:$0xf0]  ;;  %v3471_v23 = vld [vmem:[%s7389_s1 + $0xa0] sm:$0xf]  ;;  %v4922_v24 = vld [vmem:[%s7389_s1 + $0xac] sm:$0xf0] }
  0x1c   : > { %v3500_v25 = vor.u32 %v4925_v20, %v3497_v22  ;;  %v4920_v26 = vld [vmem:[%s7389_s1 + $0xa4] sm:$0xf]  ;;  %v3473_v27 = vld [vmem:[%s7389_s1 + $0xb0] sm:$0xf0]  ;;  %v3479_v28 = vld [vmem:[%s7389_s1 + $0xa8] sm:$0xf]  ;;  %v3472_v29 = vor.u32 %v4922_v24, %v3471_v23 }
  0x1d   : > { %571 = vmatpush.bf16.msra.mxu0 %v3488_v16  ;;  %v4923_v30 = vld [vmem:[%s7389_s1 + $0xb4] sm:$0xf0]  ;;  %v4921_v31 = vld [vmem:[%s7389_s1 + $0xac] sm:$0xf]  ;;  %v3481_v32 = vld [vmem:[%s7389_s1 + $0xb8] sm:$0xf0]  ;;  %v3476_v33 = vor.u32 %v4920_v26, %v3473_v27 }
  0x1e   : > { %585 = vmatpush.bf16.msra.mxu1 %v3492_v17  ;;  %599 = vmatpush.bf16.msra.mxu2 %v3496_v21  ;;  %v3480_v34 = vor.u32 %v4923_v30, %v3479_v28  ;;  %v3455_v35 = vld [vmem:[%s7389_s1 + $0x80] sm:$0xf]  ;;  %v4918_v36 = vld [vmem:[%s7389_s1 + $0x8c] sm:$0xf0]  ;;  %v4916_v37 = vld [vmem:[%s7389_s1 + $0x84] sm:$0xf]  ;;  %v3484_v38 = vor.u32 %v4921_v31, %v3481_v32 }
  0x1f   : > { %613 = vmatpush.bf16.msra.mxu3 %v3500_v25  ;;  %v3457_v39 = vld [vmem:[%s7389_s1 + $0x90] sm:$0xf0]  ;;  %v3463_v40 = vld [vmem:[%s7389_s1 + $0x88] sm:$0xf]  ;;  %v4919_v41 = vld [vmem:[%s7389_s1 + $0x94] sm:$0xf0]  ;;  %v3456_v44 = vor.u32 %v4918_v36, %v3455_v35 }
  0x20   : > { %v4917_v42 = vld [vmem:[%s7389_s1 + $0x8c] sm:$0xf]  ;;  %v3465_v43 = vld [vmem:[%s7389_s1 + $0x98] sm:$0xf0]  ;;  %v3571_v45 = vld [vmem:[%s7389_s1 + $0x60] sm:$0xf]  ;;  %v3460_v48 = vor.u32 %v4916_v37, %v3457_v39  ;;  %v3464_v49 = vor.u32 %v4919_v41, %v3463_v40 }
  0x21   : > { %572 = vmatpush.bf16.msra.mxu0 %v3472_v29  ;;  %v4914_v46 = vld [vmem:[%s7389_s1 + $0x6c] sm:$0xf0]  ;;  %v4912_v47 = vld [vmem:[%s7389_s1 + $0x64] sm:$0xf]  ;;  %s434_s24 = scalar_select %p433_p10, %s5412_s29, 1  ;;  %v3468_v52 = vor.u32 %v4917_v42, %v3465_v43  ;;  %vm562_vm0 = vcmask 523264  }
  0x22   : > { %586 = vmatpush.bf16.msra.mxu1 %v3476_v33  ;;  %600 = vmatpush.bf16.msra.mxu2 %v3480_v34  ;;  %v3573_v50 = vld [vmem:[%s7389_s1 + $0x70] sm:$0xf0]  ;;  %v3579_v51 = vld [vmem:[%s7389_s1 + $0x68] sm:$0xf]  ;;  %v3572_v53 = vor.u32 %v4914_v46, %v3571_v45  ;;  %v4915_v54 = vld [vmem:[%s7389_s1 + $0x74] sm:$0xf0] }
  0x23   : > { %614 = vmatpush.bf16.msra.mxu3 %v3484_v38  ;;  %v4913_v55 = vld [vmem:[%s7389_s1 + $0x6c] sm:$0xf]  ;;  %v3581_v56 = vld [vmem:[%s7389_s1 + $0x78] sm:$0xf0]  ;;  %s4899_s30 = sshll.u32 %s434_s24, 4  ;;  %v3576_v57 = vor.u32 %v4912_v47, %v3573_v50  ;;  %v3580_v58 = vor.u32 %v4915_v54, %v3579_v51  ;;  %vm1414_vm1 = vcmask 1046528  }
  0x24   : > { %v3555_v59 = vld [vmem:[%s7389_s1 + $0x40] sm:$0xf]  ;;  %v4910_v60 = vld [vmem:[%s7389_s1 + $0x4c] sm:$0xf0]  ;;  %s437_s20 = scalar_lea.vmem %s7388_s0, %s4899_s30  ;;  %v3584_v61 = vor.u32 %v4913_v55, %v3581_v56  ;;  %v4908_v62 = vld [vmem:[%s7389_s1 + $0x44] sm:$0xf] }
  0x25   : > { %573 = vmatpush.bf16.msra.mxu0 %v3456_v44  ;;  %v3557_v63 = vld [vmem:[%s7389_s1 + $0x50] sm:$0xf0]  ;;  %v3563_v0 = vld [vmem:[%s7389_s1 + $0x48] sm:$0xf]  ;;  %v439_v1 = vld [vmem:[%s437_s20] sm:$0xff]  ;;  %v3556_v5 = vor.u32 %v4910_v60, %v3555_v59  ;;  %vm1410_vm2 = vcmask 113664  }
  0x26   : > { %587 = vmatpush.bf16.msra.mxu1 %v3460_v48  ;;  %601 = vmatpush.bf16.msra.mxu2 %v3464_v49  ;;  %v440_v2 = vld [vmem:[%s437_s20 + $0x8] sm:$0xff]  ;;  %v4911_v3 = vld [vmem:[%s7389_s1 + $0x54] sm:$0xf0]  ;;  %v3565_v7 = vld [vmem:[%s7389_s1 + $0x58] sm:$0xf0]  ;;  %v3560_v8 = vor.u32 %v4908_v62, %v3557_v63  ;;  %vm2901_vm3 = vcmask 1041408  }
  0x27   : > { %615 = vmatpush.bf16.msra.mxu3 %v3468_v52  ;;  %v5582_v4 = vpack.c.bf16 %v440_v2, %v439_v1  ;;  %v4909_v6 = vld [vmem:[%s7389_s1 + $0x4c] sm:$0xf]  ;;  %v3564_v9 = vor.u32 %v4911_v3, %v3563_v0  ;;  %v3539_v10 = vld [vmem:[%s7389_s1 + $0x20] sm:$0xf]  ;;  %v4906_v14 = vld [vmem:[%s7389_s1 + $0x2c] sm:$0xf0] }
  0x28   : > { %v3568_v13 = vor.u32 %v4909_v6, %v3565_v7  ;;  %v4904_v15 = vld [vmem:[%s7389_s1 + $0x24] sm:$0xf]  ;;  %v3541_v16 = vld [vmem:[%s7389_s1 + $0x30] sm:$0xf0]  ;;  %v3547_v17 = vld [vmem:[%s7389_s1 + $0x28] sm:$0xf]  ;;  %v3540_v24 = vor.u32 %v4906_v14, %v3539_v10 }
  0x29   : > { %708 = vmatpush.bf16.msrb.mxu0 %v3572_v53  ;;  %v476_v11 = vshrl.u32 %v5582_v4, 16  ;;  %v478_v12 = vshll.u32 %v5582_v4, 16  ;;  %v4907_v18 = vld [vmem:[%s7389_s1 + $0x34] sm:$0xf0]  ;;  %v4905_v20 = vld [vmem:[%s7389_s1 + $0x2c] sm:$0xf]  ;;  %v3544_v25 = vor.u32 %v4904_v15, %v3541_v16 }
  0x2a   : > { %722 = vmatpush.bf16.msrb.mxu1 %v3576_v57  ;;  %736 = vmatpush.bf16.msrb.mxu2 %v3580_v58  ;;  %v3549_v21 = vld [vmem:[%s7389_s1 + $0x38] sm:$0xf0]  ;;  %v3523_v22 = vld [vmem:[%s7389_s1] sm:$0xf]  ;;  %v4902_v26 = vld [vmem:[%s7389_s1 + $0xc] sm:$0xf0]  ;;  %v3548_v29 = vor.u32 %v4907_v18, %v3547_v17 }
  0x2b   : > { %750 = vmatpush.bf16.msrb.mxu3 %v3584_v61  ;;  %v480_v19 = vrot.slane %v478_v12, 1  ;;  %v4900_v27 = vld [vmem:[%s7389_s1 + $0x4] sm:$0xf]  ;;  %v3525_v28 = vld [vmem:[%s7389_s1 + $0x10] sm:$0xf0]  ;;  %v3552_v30 = vor.u32 %v4905_v20, %v3549_v21  ;;  %v3524_v40 = vor.u32 %v4902_v26, %v3523_v22  ;;  %vm2902_vm4 = vcmask 1042432  }
  0x2c   : > { %v3531_v31 = vld [vmem:[%s7389_s1 + $0x8] sm:$0xf]  ;;  %v4903_v32 = vld [vmem:[%s7389_s1 + $0x14] sm:$0xf0]  ;;  %v4901_v33 = vld [vmem:[%s7389_s1 + $0xc] sm:$0xf]  ;;  %v3528_v41 = vor.u32 %v4900_v27, %v3525_v28 }
  0x2d   : > { %709 = vmatpush.bf16.msrb.mxu0 %v3556_v5  ;;  %v481_v23 = vor.u32 %v480_v19, %v476_v11  ;;  %v3533_v34 = vld [vmem:[%s7389_s1 + $0x18] sm:$0xf0]  ;;  %v3655_v35 = vld [vmem:[%s7389_s1 + $0x160] sm:$0xf]  ;;  %v4946_v36 = vld [vmem:[%s7389_s1 + $0x16c] sm:$0xf0]  ;;  %v3532_v45 = vor.u32 %v4903_v32, %v3531_v31 }
  0x2e   : > { %723 = vmatpush.bf16.msrb.mxu1 %v3560_v8  ;;  %737 = vmatpush.bf16.msrb.mxu2 %v3564_v9  ;;  %v4944_v37 = vld [vmem:[%s7389_s1 + $0x164] sm:$0xf]  ;;  %v3657_v38 = vld [vmem:[%s7389_s1 + $0x170] sm:$0xf0]  ;;  %v3663_v39 = vld [vmem:[%s7389_s1 + $0x168] sm:$0xf]  ;;  %v3536_v46 = vor.u32 %v4901_v33, %v3533_v34  ;;  %v3656_v47 = vor.u32 %v4946_v36, %v3655_v35 }
  0x2f   : > { %751 = vmatpush.bf16.msrb.mxu3 %v3568_v13  ;;  %3517 = vmatmul.msk.bf16.vlgmr.msra.gmra.mxu0 %vm562_vm0, %v481_v23  ;;  %v4947_v42 = vld [vmem:[%s7389_s1 + $0x174] sm:$0xf0]  ;;  %v4945_v43 = vld [vmem:[%s7389_s1 + $0x16c] sm:$0xf]  ;;  %v3665_v44 = vld [vmem:[%s7389_s1 + $0x178] sm:$0xf0]  ;;  %v3660_v48 = vor.u32 %v4944_v37, %v3657_v38 }
  0x30   : > { %3518 = vmatmul.msk.bf16.vlgmr.msra.gmra.mxu1 %vm562_vm0, %v481_v23  ;;  %3519 = vmatmul.msk.bf16.vlgmr.msra.gmra.mxu2 %vm562_vm0, %v481_v23  ;;  %v3639_v49 = vld [vmem:[%s7389_s1 + $0x140] sm:$0xf]  ;;  %v4942_v50 = vld [vmem:[%s7389_s1 + $0x14c] sm:$0xf0]  ;;  %v3664_v51 = vor.u32 %v4947_v42, %v3663_v39  ;;  %v3668_v52 = vor.u32 %v4945_v43, %v3665_v44  ;;  %v4940_v53 = vld [vmem:[%s7389_s1 + $0x144] sm:$0xf] }
  0x31   : > { %3520 = vmatmul.msk.bf16.vlgmr.msra.gmra.mxu3 %vm562_vm0, %v481_v23  ;;  %710 = vmatpush.bf16.msrb.mxu0 %v3540_v24  ;;  %v3641_v54 = vld [vmem:[%s7389_s1 + $0x150] sm:$0xf0]  ;;  %v3647_v55 = vld [vmem:[%s7389_s1 + $0x148] sm:$0xf]  ;;  %v4943_v56 = vld [vmem:[%s7389_s1 + $0x154] sm:$0xf0]  ;;  %v3640_v59 = vor.u32 %v4942_v50, %v3639_v49 }
  0x32   : > { %724 = vmatpush.bf16.msrb.mxu1 %v3544_v25  ;;  %738 = vmatpush.bf16.msrb.mxu2 %v3548_v29  ;;  %v4941_v57 = vld [vmem:[%s7389_s1 + $0x14c] sm:$0xf]  ;;  %v3649_v58 = vld [vmem:[%s7389_s1 + $0x158] sm:$0xf0]  ;;  %v3644_v60 = vor.u32 %v4940_v53, %v3641_v54  ;;  %v3648_v61 = vor.u32 %v4943_v56, %v3647_v55  ;;  %v3623_v63 = vld [vmem:[%s7389_s1 + $0x120] sm:$0xf] }
  0x33   : > { %752 = vmatpush.bf16.msrb.mxu3 %v3552_v30  ;;  %v3652_v62 = vor.u32 %v4941_v57, %v3649_v58  ;;  %v4938_v0 = vld [vmem:[%s7389_s1 + $0x12c] sm:$0xf0]  ;;  %v4936_v1 = vld [vmem:[%s7389_s1 + $0x124] sm:$0xf]  ;;  %v3625_v2 = vld [vmem:[%s7389_s1 + $0x130] sm:$0xf0] }
  0x34   : > { %v3631_v3 = vld [vmem:[%s7389_s1 + $0x128] sm:$0xf]  ;;  %v4939_v5 = vld [vmem:[%s7389_s1 + $0x134] sm:$0xf0]  ;;  %v4937_v6 = vld [vmem:[%s7389_s1 + $0x12c] sm:$0xf]  ;;  %v3624_v8 = vor.u32 %v4938_v0, %v3623_v63  ;;  %v3628_v9 = vor.u32 %v4936_v1, %v3625_v2 }
  0x35   : > { %711 = vmatpush.bf16.msrb.mxu0 %v3524_v40  ;;  %v3633_v7 = vld [vmem:[%s7389_s1 + $0x138] sm:$0xf0]  ;;  %v3607_v10 = vld [vmem:[%s7389_s1 + $0x100] sm:$0xf]  ;;  %v4934_v11 = vld [vmem:[%s7389_s1 + $0x10c] sm:$0xf0]  ;;  %v3632_v12 = vor.u32 %v4939_v5, %v3631_v3 }
  0x36   : > { %725 = vmatpush.bf16.msrb.mxu1 %v3528_v41  ;;  %739 = vmatpush.bf16.msrb.mxu2 %v3532_v45  ;;  %v3636_v13 = vor.u32 %v4937_v6, %v3633_v7  ;;  %v4932_v14 = vld [vmem:[%s7389_s1 + $0x104] sm:$0xf]  ;;  %v3609_v15 = vld [vmem:[%s7389_s1 + $0x110] sm:$0xf0]  ;;  %v3615_v16 = vld [vmem:[%s7389_s1 + $0x108] sm:$0xf]  ;;  %v3608_v20 = vor.u32 %v4934_v11, %v3607_v10 }
  0x37   : > { %753 = vmatpush.bf16.msrb.mxu3 %v3536_v46  ;;  %v4935_v17 = vld [vmem:[%s7389_s1 + $0x114] sm:$0xf0]  ;;  %v4933_v18 = vld [vmem:[%s7389_s1 + $0x10c] sm:$0xf]  ;;  %v3617_v19 = vld [vmem:[%s7389_s1 + $0x118] sm:$0xf0]  ;;  %v3612_v21 = vor.u32 %v4932_v14, %v3609_v15 }
  0x38   : > { %v3616_v22 = vor.u32 %v4935_v17, %v3615_v16  ;;  %v3620_v23 = vor.u32 %v4933_v18, %v3617_v19  ;;  %v778_v24 = vrot.slane %v5582_v4, 1  ;;  %v3731_v25 = vld [vmem:[%s7391_s3 + $0x70] sm:$0xf]  ;;  %v4963_v26 = vld [vmem:[%s7391_s3 + $0x74] sm:$0xf0]  ;;  %vm2897_vm5 = vcmask 39936  }
  0x39   : > { %866 = vmatpush.bf16.msra.mxu0 %v3656_v47  ;;  %v3732_v27 = vor.u32 %v4963_v26, %v3731_v25  ;;  %v4979_v28 = vld [vmem:[%s7391_s3 + $0xf4] sm:$0xf0]  ;;  %v3723_v30 = vld [vmem:[%s7391_s3 + $0x60] sm:$0xf]  ;;  %v4961_v31 = vld [vmem:[%s7391_s3 + $0x64] sm:$0xf0] }
  0x3a   : > { %880 = vmatpush.bf16.msra.mxu1 %v3660_v48  ;;  %894 = vmatpush.bf16.msra.mxu2 %v3664_v51  ;;  %v3787_v32 = vld [vmem:[%s7391_s3 + $0xe0] sm:$0xf]  ;;  %v3724_v33 = vor.u32 %v4961_v31, %v3723_v30  ;;  %v4977_v34 = vld [vmem:[%s7391_s3 + $0xe4] sm:$0xf0]  ;;  %v3715_v35 = vld [vmem:[%s7391_s3 + $0x50] sm:$0xf] }
  0x3b   : > { %908 = vmatpush.bf16.msra.mxu3 %v3668_v52  ;;  %v4959_v36 = vld [vmem:[%s7391_s3 + $0x54] sm:$0xf0]  ;;  %v3788_v37 = vor.u32 %v4977_v34, %v3787_v32  ;;  %v3779_v38 = vld [vmem:[%s7391_s3 + $0xd0] sm:$0xf]  ;;  %v3707_v42 = vld [vmem:[%s7391_s3 + $0x40] sm:$0xf] }
  0x3c   : > { %v4975_v39 = vld [vmem:[%s7391_s3 + $0xd4] sm:$0xf0]  ;;  %v3716_v40 = vor.u32 %v4959_v36, %v3715_v35  ;;  %v4957_v43 = vld [vmem:[%s7391_s3 + $0x44] sm:$0xf0]  ;;  %v3771_v44 = vld [vmem:[%s7391_s3 + $0xc0] sm:$0xf] }
  0x3d   : > { %867 = vmatpush.bf16.msra.mxu0 %v3640_v59  ;;  %v3780_v41 = vor.u32 %v4975_v39, %v3779_v38  ;;  %v3708_v45 = vor.u32 %v4957_v43, %v3707_v42  ;;  %v4973_v46 = vld [vmem:[%s7391_s3 + $0xc4] sm:$0xf0]  ;;  %v3699_v48 = vld [vmem:[%s7391_s3 + $0x30] sm:$0xf]  ;;  %v4955_v49 = vld [vmem:[%s7391_s3 + $0x34] sm:$0xf0] }
  0x3e   : > { %881 = vmatpush.bf16.msra.mxu1 %v3644_v60  ;;  %895 = vmatpush.bf16.msra.mxu2 %v3648_v61  ;;  %v3772_v47 = vor.u32 %v4973_v46, %v3771_v44  ;;  %v3763_v50 = vld [vmem:[%s7391_s3 + $0xb0] sm:$0xf]  ;;  %v3700_v51 = vor.u32 %v4955_v49, %v3699_v48  ;;  %v4971_v52 = vld [vmem:[%s7391_s3 + $0xb4] sm:$0xf0]  ;;  %v3691_v57 = vld [vmem:[%s7391_s3 + $0x20] sm:$0xf] }
  0x3f   : > { %909 = vmatpush.bf16.msra.mxu3 %v3652_v62  ;;  %3585 = vmatmul.msk.bf16.vlgmr.msrb.gmra.mxu0 %vm562_vm0, %v5582_v4  ;;  %v3764_v53 = vor.u32 %v4971_v52, %v3763_v50  ;;  %v3859_v54 = vld [vmem:[%s7391_s3 + $0x170] sm:$0xf]  ;;  %v4995_v55 = vld [vmem:[%s7391_s3 + $0x174] sm:$0xf0]  ;;  %v4953_v58 = vld [vmem:[%s7391_s3 + $0x24] sm:$0xf0] }
  0x40   : > { %3586 = vmatmul.msk.bf16.vlgmr.msrb.gmra.mxu1 %vm562_vm0, %v5582_v4  ;;  %3587 = vmatmul.msk.bf16.vlgmr.msrb.gmra.mxu2 %vm562_vm0, %v5582_v4  ;;  %v3860_v56 = vor.u32 %v4995_v55, %v3859_v54  ;;  %v3755_v59 = vld [vmem:[%s7391_s3 + $0xa0] sm:$0xf]  ;;  %v3692_v60 = vor.u32 %v4953_v58, %v3691_v57  ;;  %v4969_v61 = vld [vmem:[%s7391_s3 + $0xa4] sm:$0xf0]  ;;  %v3891_v63 = vld [vmem:[%s7391_s3 + $0x1b0] sm:$0xf] }
  0x41   : > { %3588 = vmatmul.msk.bf16.vlgmr.msrb.gmra.mxu3 %vm562_vm0, %v5582_v4  ;;  %868 = vmatpush.bf16.msra.mxu0 %v3624_v8  ;;  %v3795_v4 = vld [vmem:[%s7391_s3 + $0xf0] sm:$0xf]  ;;  %v3756_v62 = vor.u32 %v4969_v61, %v3755_v59  ;;  %v5003_v0 = vld [vmem:[%s7391_s3 + $0x1b4] sm:$0xf0]  ;;  %v3851_v1 = vld [vmem:[%s7391_s3 + $0x160] sm:$0xf] }
  0x42   : > { %882 = vmatpush.bf16.msra.mxu1 %v3628_v9  ;;  %896 = vmatpush.bf16.msra.mxu2 %v3632_v12  ;;  %v3796_v29 = vor.u32 %v4979_v28, %v3795_v4  ;;  %v3892_v2 = vor.u32 %v5003_v0, %v3891_v63  ;;  %v4993_v3 = vld [vmem:[%s7391_s3 + $0x164] sm:$0xf0]  ;;  %v3683_v5 = vld [vmem:[%s7391_s3 + $0x10] sm:$0xf]  ;;  %v4951_v6 = vld [vmem:[%s7391_s3 + $0x14] sm:$0xf0] }
  0x43   : > { %910 = vmatpush.bf16.msra.mxu3 %v3636_v13  ;;  %v3852_v7 = vor.u32 %v4993_v3, %v3851_v1  ;;  %v3684_v8 = vor.u32 %v4951_v6, %v3683_v5  ;;  %v3747_v9 = vld [vmem:[%s7391_s3 + $0x90] sm:$0xf]  ;;  %v4967_v10 = vld [vmem:[%s7391_s3 + $0x94] sm:$0xf0]  ;;  %v3883_v12 = vld [vmem:[%s7391_s3 + $0x1a0] sm:$0xf] }
  0x44   : > { %v3748_v11 = vor.u32 %v4967_v10, %v3747_v9  ;;  %v5001_v13 = vld [vmem:[%s7391_s3 + $0x1a4] sm:$0xf0]  ;;  %v3843_v15 = vld [vmem:[%s7391_s3 + $0x150] sm:$0xf]  ;;  %v4991_v16 = vld [vmem:[%s7391_s3 + $0x154] sm:$0xf0] }
  0x45   : > { %869 = vmatpush.bf16.msra.mxu0 %v3608_v20  ;;  %v3884_v14 = vor.u32 %v5001_v13, %v3883_v12  ;;  %v3844_v17 = vor.u32 %v4991_v16, %v3843_v15  ;;  %v3675_v18 = vld [vmem:[%s7391_s3] sm:$0xf]  ;;  %v4949_v19 = vld [vmem:[%s7391_s3 + $0x4] sm:$0xf0]  ;;  %v4978_v25 = vld [vmem:[%s7391_s3 + $0xf4] sm:$0xf] }
  0x46   : > { %883 = vmatpush.bf16.msra.mxu1 %v3612_v21  ;;  %897 = vmatpush.bf16.msra.mxu2 %v3616_v22  ;;  %v3739_v20 = vld [vmem:[%s7391_s3 + $0x80] sm:$0xf]  ;;  %v3797_v26 = vld [vmem:[%s7391_s3 + $0xf8] sm:$0xf0]  ;;  %v4994_v28 = vld [vmem:[%s7391_s3 + $0x174] sm:$0xf] }
  0x47   : > { %911 = vmatpush.bf16.msra.mxu3 %v3620_v23  ;;  %v3676_v23 = vor.u32 %v4949_v19, %v3675_v18  ;;  %v3875_v31 = vld [vmem:[%s7391_s3 + $0x190] sm:$0xf]  ;;  %v4999_v32 = vld [vmem:[%s7391_s3 + $0x194] sm:$0xf0]  ;;  %v3835_v34 = vld [vmem:[%s7391_s3 + $0x140] sm:$0xf] }
  0x48   : > { %v4989_v35 = vld [vmem:[%s7391_s3 + $0x144] sm:$0xf0]  ;;  %v3789_v38 = vld [vmem:[%s7391_s3 + $0xe8] sm:$0xf0]  ;;  %v4992_v39 = vld [vmem:[%s7391_s3 + $0x164] sm:$0xf] }
  0x49   : > { %1295 = vmatpush.bf16.msrb.mxu0 %v3732_v27  ;;  %v3800_v27 = vor.u32 %v4978_v25, %v3797_v26  ;;  %v3836_v36 = vor.u32 %v4989_v35, %v3835_v34  ;;  %v3867_v42 = vld [vmem:[%s7391_s3 + $0x180] sm:$0xf]  ;;  %v4997_v43 = vld [vmem:[%s7391_s3 + $0x184] sm:$0xf0]  ;;  %v3827_v46 = vld [vmem:[%s7391_s3 + $0x130] sm:$0xf] }
  0x4a   : > { %1309 = vmatpush.bf16.msrb.mxu1 %v3796_v29  ;;  %1323 = vmatpush.bf16.msrb.mxu2 %v3860_v56  ;;  %v3861_v29 = vld [vmem:[%s7391_s3 + $0x178] sm:$0xf0]  ;;  %v4962_v48 = vld [vmem:[%s7391_s3 + $0x74] sm:$0xf]  ;;  %v4985_v63 = vld [vmem:[%s7391_s3 + $0x124] sm:$0xf0] }
  0x4b   : > { %1341 = vmatpush.bf16.msrb.mxu3 %v3892_v2  ;;  %v3864_v30 = vor.u32 %v4994_v28, %v3861_v29  ;;  %v3733_v52 = vld [vmem:[%s7391_s3 + $0x78] sm:$0xf0]  ;;  %v4974_v56 = vld [vmem:[%s7391_s3 + $0xd4] sm:$0xf]  ;;  %v4960_v0 = vld [vmem:[%s7391_s3 + $0x64] sm:$0xf] }
  0x4c   : > { %v3736_v55 = vor.u32 %v4962_v48, %v3733_v52  ;;  %v3781_v57 = vld [vmem:[%s7391_s3 + $0xd8] sm:$0xf0]  ;;  %v4990_v59 = vld [vmem:[%s7391_s3 + $0x154] sm:$0xf]  ;;  %v3725_v2 = vld [vmem:[%s7391_s3 + $0x68] sm:$0xf0] }
  0x4d   : > { %1296 = vmatpush.bf16.msrb.mxu0 %v3724_v33  ;;  %v3876_v33 = vor.u32 %v4999_v32, %v3875_v31  ;;  %v3784_v58 = vor.u32 %v4974_v56, %v3781_v57  ;;  %v3728_v3 = vor.u32 %v4960_v0, %v3725_v2  ;;  %v4972_v5 = vld [vmem:[%s7391_s3 + $0xc4] sm:$0xf]  ;;  %v3773_v6 = vld [vmem:[%s7391_s3 + $0xc8] sm:$0xf0]  ;;  %v4983_v12 = vld [vmem:[%s7391_s3 + $0x114] sm:$0xf0] }
  0x4e   : > { %1310 = vmatpush.bf16.msrb.mxu1 %v3788_v37  ;;  %1324 = vmatpush.bf16.msrb.mxu2 %v3852_v7  ;;  %v4976_v37 = vld [vmem:[%s7391_s3 + $0xe4] sm:$0xf]  ;;  %v3837_v9 = vld [vmem:[%s7391_s3 + $0x148] sm:$0xf0]  ;;  %v4958_v13 = vld [vmem:[%s7391_s3 + $0x54] sm:$0xf] }
  0x4f   : > { %3669 = vmatmul.msk.bf16.vlgmr.msra.gmra.mxu0 %vm562_vm0, %v778_v24  ;;  %1342 = vmatpush.bf16.msrb.mxu3 %v3884_v14  ;;  %v4988_v7 = vld [vmem:[%s7391_s3 + $0x144] sm:$0xf]  ;;  %v4986_v25 = vld [vmem:[%s7391_s3 + $0x134] sm:$0xf]  ;;  %v3803_v28 = vld [vmem:[%s7391_s3 + $0x100] sm:$0xf] }
  0x50   : > { %3670 = vmatmul.msk.bf16.vlgmr.msra.gmra.mxu1 %vm562_vm0, %v778_v24  ;;  %3671 = vmatmul.msk.bf16.vlgmr.msra.gmra.mxu2 %vm562_vm0, %v778_v24  ;;  %v3840_v10 = vor.u32 %v4988_v7, %v3837_v9  ;;  %v4981_v29 = vld [vmem:[%s7391_s3 + $0x104] sm:$0xf0]  ;;  %v3709_v32 = vld [vmem:[%s7391_s3 + $0x48] sm:$0xf0]  ;;  %v4968_v34 = vld [vmem:[%s7391_s3 + $0xa4] sm:$0xf] }
  0x51   : > { %3672 = vmatmul.msk.bf16.vlgmr.msra.gmra.mxu3 %vm562_vm0, %v778_v24  ;;  %1297 = vmatpush.bf16.msrb.mxu0 %v3716_v40  ;;  %v4965_v24 = vld [vmem:[%s7391_s3 + $0x84] sm:$0xf0]  ;;  %v3792_v40 = vor.u32 %v4976_v37, %v3789_v38  ;;  %v3804_v31 = vor.u32 %v4981_v29, %v3803_v28  ;;  %v3757_v35 = vld [vmem:[%s7391_s3 + $0xa8] sm:$0xf0]  ;;  %v4966_v52 = vld [vmem:[%s7391_s3 + $0x94] sm:$0xf] }
  0x52   : > { %1311 = vmatpush.bf16.msrb.mxu1 %v3780_v41  ;;  %1325 = vmatpush.bf16.msrb.mxu2 %v3844_v17  ;;  %v3740_v4 = vor.u32 %v4965_v24, %v3739_v20  ;;  %v3853_v41 = vld [vmem:[%s7391_s3 + $0x168] sm:$0xf0]  ;;  %v3717_v17 = vld [vmem:[%s7391_s3 + $0x58] sm:$0xf0]  ;;  %v3760_v37 = vor.u32 %v4968_v34, %v3757_v35  ;;  %v4982_v56 = vld [vmem:[%s7391_s3 + $0x114] sm:$0xf] }
  0x53   : > { %1343 = vmatpush.bf16.msrb.mxu3 %v3876_v33  ;;  %v3856_v44 = vor.u32 %v4992_v39, %v3853_v41  ;;  %v3720_v20 = vor.u32 %v4958_v13, %v3717_v17  ;;  %v3765_v24 = vld [vmem:[%s7391_s3 + $0xb8] sm:$0xf0]  ;;  %v3821_v38 = vld [vmem:[%s7391_s3 + $0x128] sm:$0xf0]  ;;  %v4950_v9 = vld [vmem:[%s7391_s3 + $0x14] sm:$0xf] }
  0x54   : > { %v3701_v41 = vld [vmem:[%s7391_s3 + $0x38] sm:$0xf0]  ;;  %v3885_v0 = vld [vmem:[%s7391_s3 + $0x1a8] sm:$0xf0]  ;;  %vm3047_vm6 = vcmask 1040384   ;;  %s3376_s20 = sshll.u32 %s3372_s17, 4  ;;  %s3377_s20 = int_to_ptr.hbm [resolvable:$true] %s3376_s20 }
  0x55   : > { %1298 = vmatpush.bf16.msrb.mxu0 %v3708_v45  ;;  %v3868_v45 = vor.u32 %v4997_v43, %v3867_v42  ;;  %v5002_v42 = vld [vmem:[%s7391_s3 + $0x1b4] sm:$0xf]  ;;  %v3869_v29 = vld [vmem:[%s7391_s3 + $0x188] sm:$0xf0]  ;;  %s5270_s24 = sshra.s32 %s3377_s20, 4  ;;  %s5271_s24 = int_to_ptr.hbm [resolvable:$true] %s5270_s24 }
  0x56   : > { %1312 = vmatpush.bf16.msrb.mxu1 %v3772_v47  ;;  %1326 = vmatpush.bf16.msrb.mxu2 %v3836_v36  ;;  %v4987_v47 = vld [vmem:[%s7391_s3 + $0x134] sm:$0xf0]  ;;  %v4984_v36 = vld [vmem:[%s7391_s3 + $0x124] sm:$0xf]  ;;  %s5272_s23 = scalar_lea.hbm %s5271_s24, 1  ;;  %p5277_p0 = scmp.lt.s32.totalorder %s5271_s24, %s7401_s13 }
  0x57   : > { %1344 = vmatpush.bf16.msrb.mxu3 %v3868_v45  ;;  %v3824_v39 = vor.u32 %v4984_v36, %v3821_v38  ;;  %p5273_p11 = scmp.ne.s32.totalorder %s5271_s24, %s5272_s23  ;;  %p5278_p1 = scmp.lt.s32.totalorder %s5276_s19, %s5272_s23 }
  0x59   : > { %1299 = vmatpush.bf16.msrb.mxu0 %v3700_v51  ;;  %v3828_v51 = vor.u32 %v4987_v47, %v3827_v46  ;;  %v3893_v46 = vld [vmem:[%s7391_s3 + $0x1b8] sm:$0xf0]  ;;  %p5274_p12 = pnand %p5273_p11, %p5429_p5  ;;  %p5279_p2 = por %p5278_p1, %p5277_p0 }
  0x5a   : > { %1313 = vmatpush.bf16.msrb.mxu1 %v3764_v53 }
  0x5b   : > { %1327 = vmatpush.bf16.msrb.mxu2 %v3828_v51  ;;  %1351 = vmatpush.bf16.msra.mxu3 %v3736_v55  ;;  %v3896_v51 = vor.u32 %v5002_v42, %v3893_v46  ;;  %v3749_v55 = vld [vmem:[%s7391_s3 + $0x98] sm:$0xf0]  ;;  %p5275_p13 = pneg %p5274_p12 }
  0x5c   : > { %v3752_v57 = vor.u32 %v4966_v52, %v3749_v55 }
  0x5d   : > { %1300 = vmatpush.bf16.msrb.mxu0 %v3692_v60  ;;  %v3845_v60 = vld [vmem:[%s7391_s3 + $0x158] sm:$0xf0]  ;;  %p5280_p3 = pnand %p5279_p2, %p5275_p13 }
  0x5e   : > { %1314 = vmatpush.bf16.msrb.mxu1 %v3756_v62  ;;  %v3848_v61 = vor.u32 %v4990_v59, %v3845_v60  ;;  %v3819_v62 = vld [vmem:[%s7391_s3 + $0x120] sm:$0xf]  ;;  %v4952_v59 = vld [vmem:[%s7391_s3 + $0x24] sm:$0xf]  ;;  %v3693_v60 = vld [vmem:[%s7391_s3 + $0x28] sm:$0xf0] }
  0x5f   : > { %v3820_v1 = vor.u32 %v4985_v63, %v3819_v62  ;;  %1352 = vmatpush.bf16.msra.mxu3 %v3728_v3  ;;  %v3696_v62 = vor.u32 %v4952_v59, %v3693_v60  ;;  %v5000_v63 = vld [vmem:[%s7391_s3 + $0x1a4] sm:$0xf]  ;;  %v3741_v3 = vld [vmem:[%s7391_s3 + $0x88] sm:$0xf0] }
  0x60   : > { %v3888_v2 = vor.u32 %v5000_v63, %v3885_v0 }
  0x61   : > { %1301 = vmatpush.bf16.msrb.mxu0 %v3684_v8  ;;  %v3776_v8 = vor.u32 %v4972_v5, %v3773_v6  ;;  %1328 = vmatpush.bf16.msrb.mxu2 %v3820_v1  ;;  %v4964_v1 = vld [vmem:[%s7391_s3 + $0x84] sm:$0xf]  ;;  %v3805_v6 = vld [vmem:[%s7391_s3 + $0x108] sm:$0xf0] }
  0x62   : > { %1315 = vmatpush.bf16.msrb.mxu1 %v3748_v11  ;;  %v3811_v11 = vld [vmem:[%s7391_s3 + $0x110] sm:$0xf]  ;;  %v4980_v5 = vld [vmem:[%s7391_s3 + $0x104] sm:$0xf]  ;;  %v3744_v7 = vor.u32 %v4964_v1, %v3741_v3 }
  0x63   : > { %v3812_v16 = vor.u32 %v4983_v12, %v3811_v11  ;;  %1353 = vmatpush.bf16.msra.mxu3 %v3720_v20  ;;  %v4998_v11 = vld [vmem:[%s7391_s3 + $0x194] sm:$0xf]  ;;  %v3877_v12 = vld [vmem:[%s7391_s3 + $0x198] sm:$0xf0] }
  0x65   : > { %1302 = vmatpush.bf16.msrb.mxu0 %v3676_v23  ;;  %v4970_v23 = vld [vmem:[%s7391_s3 + $0xb4] sm:$0xf]  ;;  %1329 = vmatpush.bf16.msrb.mxu2 %v3812_v16  ;;  %v3880_v16 = vor.u32 %v4998_v11, %v3877_v12 }
  0x66   : > { %1316 = vmatpush.bf16.msrb.mxu1 %v3740_v4  ;;  %v3768_v26 = vor.u32 %v4970_v23, %v3765_v24  ;;  %v3829_v4 = vld [vmem:[%s7391_s3 + $0x138] sm:$0xf0] }
  0x69   : > { %1365 = vmatpush.bf16.msra.mxu0 %v3800_v27  ;;  %v3832_v27 = vor.u32 %v4986_v25, %v3829_v4  ;;  %1330 = vmatpush.bf16.msrb.mxu2 %v3804_v31  ;;  %v4948_v25 = vld [vmem:[%s7391_s3 + $0x4] sm:$0xf] }
  0x6a   : > { %1379 = vmatpush.bf16.msra.mxu1 %v3864_v30  ;;  %v4956_v30 = vld [vmem:[%s7391_s3 + $0x44] sm:$0xf] }
  0x6b   : > { %v3712_v33 = vor.u32 %v4956_v30, %v3709_v32  ;;  %v4996_v4 = vld [vmem:[%s7391_s3 + $0x184] sm:$0xf] }
  0x6c   : > { %v3872_v32 = vor.u32 %v4996_v4, %v3869_v29 }
  0x6d   : > { %1366 = vmatpush.bf16.msra.mxu0 %v3792_v40  ;;  %1354 = vmatpush.bf16.msra.mxu3 %v3712_v33  ;;  %v4954_v40 = vld [vmem:[%s7391_s3 + $0x34] sm:$0xf] }
  0x6e   : > { %1380 = vmatpush.bf16.msra.mxu1 %v3856_v44  ;;  %v3704_v45 = vor.u32 %v4954_v40, %v3701_v41  ;;  %1397 = vmatpush.bf16.msra.mxu2 %v3896_v51 }
  0x71   : > { %1367 = vmatpush.bf16.msra.mxu0 %v3784_v58  ;;  %v3813_v58 = vld [vmem:[%s7391_s3 + $0x118] sm:$0xf0]  ;;  %1355 = vmatpush.bf16.msra.mxu3 %v3704_v45 }
  0x72   : > { %1381 = vmatpush.bf16.msra.mxu1 %v3848_v61  ;;  %v3816_v61 = vor.u32 %v4982_v56, %v3813_v58  ;;  %1398 = vmatpush.bf16.msra.mxu2 %v3888_v2 }
  0x75   : > { %1368 = vmatpush.bf16.msra.mxu0 %v3776_v8  ;;  %v3808_v8 = vor.u32 %v4980_v5, %v3805_v6  ;;  %1356 = vmatpush.bf16.msra.mxu3 %v3696_v62 }
  0x76   : > { %1382 = vmatpush.bf16.msra.mxu1 %v3840_v10  ;;  %v3685_v10 = vld [vmem:[%s7391_s3 + $0x18] sm:$0xf0]  ;;  %1399 = vmatpush.bf16.msra.mxu2 %v3880_v16 }
  0x77   : > { %v3688_v13 = vor.u32 %v4950_v9, %v3685_v10 }
  0x79   : > { %1369 = vmatpush.bf16.msra.mxu0 %v3768_v26  ;;  %v3677_v26 = vld [vmem:[%s7391_s3 + $0x8] sm:$0xf0]  ;;  %1357 = vmatpush.bf16.msra.mxu3 %v3688_v13 }
  0x7a   : > { %1383 = vmatpush.bf16.msra.mxu1 %v3832_v27  ;;  %v926_v27 = vld [vmem:[%s7390_s2] sm:$0xf]  ;;  %v3680_v28 = vor.u32 %v4948_v25, %v3677_v26  ;;  %1400 = vmatpush.bf16.msra.mxu2 %v3872_v32  ;;  %v5098_v25 = vld [vmem:[%s7393_s5 + $0x2f0] sm:$0xf0]  ;;  %v4135_v32 = vld [vmem:[%s7393_s5 + $0x2d0] sm:$0xf] }
  0x7b   : > { %v928_v34 = vperm.slane %v926_v27, 0  ;;  %v929_v36 = vperm.slane %v926_v27, 1 }
  0x7d   : > { %1370 = vmatpush.bf16.msra.mxu0 %v3760_v37  ;;  %1358 = vmatpush.bf16.msra.mxu3 %v3680_v28  ;;  %v4039_v28 = vld [vmem:[%s7393_s5 + $0x210] sm:$0xf] }
  0x7e   : > { %1384 = vmatpush.bf16.msra.mxu1 %v3824_v39 }
  0x81   : > { %1371 = vmatpush.bf16.msra.mxu0 %v3752_v57 }
  0x82   : > { %1385 = vmatpush.bf16.msra.mxu1 %v3816_v61 }
  0x85   : > { %1372 = vmatpush.bf16.msra.mxu0 %v3744_v7 }
  0x86   : > { %1386 = vmatpush.bf16.msra.mxu1 %v3808_v8 }
  0xac   : > { %v5876_v21 = vpop.f32.mrf.mxu0 }
  0xad   : > { %v5878_v22 = vpop.f32.mrf.mxu1 }
  0xb3   : > { %v5934_v49 = vpop.f32.mrf.mxu2 }
  0xb4   : > { %v5936_v50 = vpop.f32.mrf.mxu3  ;;  %v5941_v53 = vpop.f32.mrf.mxu0 }
  0xb5   : > { %v5943_v54 = vpop.f32.mrf.mxu1 }
  0xbb   : > { %v5990_v14 = vpop.f32.mrf.mxu2 }
  0xbc   : > { %v5992_v15 = vpop.f32.mrf.mxu3  ;;  %v5997_v18 = vpop.f32.mrf.mxu0 }
  0xbd   : > { %v5999_v19 = vpop.f32.mrf.mxu1  ;;  %v714_v30 = vadd.f32 %v5997_v18, %v5876_v21 }
  0xbe   : > { %v728_v31 = vadd.f32 %v5999_v19, %v5878_v22 }
  0xc3   : > { %v6046_v43 = vpop.f32.mrf.mxu2 }
  0xc4   : > { %v6048_v44 = vpop.f32.mrf.mxu3  ;;  %v715_v47 = vpop.f32.mrf.mxu0  ;;  %v742_v22 = vadd.f32 %v6046_v43, %v5934_v49 }
  0xc5   : > { %v729_v48 = vpop.f32.mrf.mxu1  ;;  %v716_v37 = vadd.f32 %v715_v47, %v5941_v53  ;;  %v756_v19 = vadd.f32 %v6048_v44, %v5936_v50  ;;  %v930_v53 = vperm.slane %v926_v27, 2 }
  0xc6   : > { %v730_v38 = vadd.f32 %v729_v48, %v5943_v54  ;;  %v931_v54 = vperm.slane %v926_v27, 3 }
  0xcb   : > { %v743_v17 = vpop.f32.mrf.mxu2 }
  0xcc   : > { %v757_v20 = vpop.f32.mrf.mxu3  ;;  %v871_v23 = vpop.f32.mrf.mxu0  ;;  %v744_v59 = vadd.f32 %v743_v17, %v5990_v14  ;;  %v4051_v17 = vld [vmem:[%s7393_s5 + $0x228] sm:$0xf] }
  0xcd   : > { %v885_v24 = vpop.f32.mrf.mxu1  ;;  %v918_v33 = vadd.f32 %v871_v23, %v714_v30  ;;  %v758_v60 = vadd.f32 %v757_v20, %v5992_v15  ;;  %v5074_v20 = vld [vmem:[%s7393_s5 + $0x230] sm:$0xf0]  ;;  %v4147_v23 = vld [vmem:[%s7393_s5 + $0x2e8] sm:$0xf] }
  0xce   : > { %v919_v35 = vadd.f32 %v885_v24, %v728_v31  ;;  %v4052_v24 = vor.u32 %v5074_v20, %v4051_v17  ;;  %v4148_v27 = vor.u32 %v5098_v25, %v4147_v23  ;;  %v5071_v31 = vld [vmem:[%s7393_s5 + $0x218] sm:$0xf0] }
  0xcf   : > { %v936_v45 = vadd.f32 %v928_v34, %v918_v33  ;;  %v5095_v33 = vld [vmem:[%s7393_s5 + $0x2d8] sm:$0xf0] }
  0xd0   : > { %v937_v21 = vadd.f32 %v929_v36, %v919_v35  ;;  %v5073_v35 = vld [vmem:[%s7393_s5 + $0x22c] sm:$0xf] }
  0xd1   : > { %v944_v48 = vmax.f32 %v936_v45, 0.0  ;;  %v4123_v45 = vld [vmem:[%s7393_s5 + $0x2b8] sm:$0xf] }
  0xd2   : > { %v945_v56 = vmax.f32 %v937_v21, 0.0  ;;  %v5092_v21 = vld [vmem:[%s7393_s5 + $0x2c0] sm:$0xf0] }
  0xd3   : > { %v899_v39 = vpop.f32.mrf.mxu2 }
  0xd4   : > { %v913_v40 = vpop.f32.mrf.mxu3  ;;  %v873_v41 = vpop.f32.mrf.mxu0  ;;  %v920_v55 = vadd.f32 %v899_v39, %v742_v22  ;;  %v4027_v39 = vld [vmem:[%s7393_s5 + $0x1f8] sm:$0xf] }
  0xd5   : > { %v887_v42 = vpop.f32.mrf.mxu1  ;;  %v922_v18 = vadd.f32 %v873_v41, %v716_v37  ;;  %v921_v47 = vadd.f32 %v913_v40, %v756_v19  ;;  %v4136_v37 = vor.u32 %v5095_v33, %v4135_v32  ;;  %v5068_v40 = vld [vmem:[%s7393_s5 + $0x200] sm:$0xf0]  ;;  %v5070_v19 = vld [vmem:[%s7393_s5 + $0x214] sm:$0xf]  ;;  %v5097_v32 = vld [vmem:[%s7393_s5 + $0x2ec] sm:$0xf] }
  0xd6   : > { %v923_v46 = vadd.f32 %v887_v42, %v730_v38  ;;  %v938_v63 = vadd.f32 %v930_v53, %v920_v55  ;;  %v4053_v38 = vld [vmem:[%s7393_s5 + $0x234] sm:$0xf0]  ;;  %v5065_v55 = vld [vmem:[%s7393_s5 + $0x1e8] sm:$0xf0] }
  0xd7   : > { %v940_v51 = vadd.f32 %v928_v34, %v922_v18  ;;  %v939_v50 = vadd.f32 %v931_v54, %v921_v47  ;;  %v4028_v18 = vor.u32 %v5068_v40, %v4027_v39  ;;  %v4056_v22 = vor.u32 %v5073_v35, %v4053_v38  ;;  %v4041_v47 = vld [vmem:[%s7393_s5 + $0x21c] sm:$0xf0]  ;;  %v4149_v33 = vld [vmem:[%s7393_s5 + $0x2f4] sm:$0xf0]  ;;  %v5053_v40 = vld [vmem:[%s7393_s5 + $0x188] sm:$0xf0] }
  0xd8   : > { %v941_v52 = vadd.f32 %v929_v36, %v923_v46  ;;  %v946_v3 = vmax.f32 %v938_v63, 0.0  ;;  %v4040_v36 = vor.u32 %v5071_v31, %v4039_v28  ;;  %v5062_v63 = vld [vmem:[%s7393_s5 + $0x1d0] sm:$0xf0]  ;;  %v4075_v28 = vld [vmem:[%s7393_s5 + $0x258] sm:$0xf] }
  0xd9   : > { %v948_v57 = vmax.f32 %v940_v51, 0.0  ;;  %v947_v5 = vmax.f32 %v939_v50, 0.0  ;;  %v4124_v51 = vor.u32 %v5092_v21, %v4123_v45  ;;  %v3967_v39 = vld [vmem:[%s7393_s5 + $0x180] sm:$0xf] }
  0xda   : > { %v949_v58 = vmax.f32 %v941_v52, 0.0  ;;  %v4015_v52 = vld [vmem:[%s7393_s5 + $0x1e0] sm:$0xf] }
  0xdb   : > { %v952_v61 = vpack.c.bf16 %v948_v57, %v944_v48  ;;  %v901_v49 = vpop.f32.mrf.mxu2  ;;  %v5089_v48 = vld [vmem:[%s7393_s5 + $0x2a8] sm:$0xf0]  ;;  %v3993_v45 = vld [vmem:[%s7393_s5 + $0x1bc] sm:$0xf0] }
  0xdc   : > { %v953_v62 = vpack.c.bf16 %v949_v58, %v945_v56  ;;  %v915_v43 = vpop.f32.mrf.mxu3  ;;  %v924_v44 = vadd.f32 %v901_v49, %v744_v59  ;;  %v6194_v59 = vld [vmem:[%s7392_s4] sm:$0xf] }
  0xdd   : > { %v925_v0 = vadd.f32 %v915_v43, %v758_v60  ;;  %1303 = vmatmul.bf16.vlgmr.msrb.gmra.mxu0 %v952_v61  ;;  %v4016_v60 = vor.u32 %v5065_v55, %v4015_v52  ;;  %v4003_v43 = vld [vmem:[%s7393_s5 + $0x1c8] sm:$0xf]  ;;  %v4063_v21 = vld [vmem:[%s7393_s5 + $0x240] sm:$0xf]  ;;  %v3968_v55 = vor.u32 %v5053_v40, %v3967_v39  ;;  %v5069_v39 = vld [vmem:[%s7393_s5 + $0x208] sm:$0xf0] }
  0xde   : > { %1317 = vmatmul.bf16.vlgmr.msrb.gmra.mxu1 %v953_v62  ;;  %v942_v1 = vadd.f32 %v930_v53, %v924_v44  ;;  %1854 = vmatpush.bf16.msrb.mxu0 %v4052_v24  ;;  %v4029_v44 = vld [vmem:[%s7393_s5 + $0x204] sm:$0xf0]  ;;  %v4005_v24 = vld [vmem:[%s7393_s5 + $0x1d4] sm:$0xf0]  ;;  %v4137_v52 = vld [vmem:[%s7393_s5 + $0x2dc] sm:$0xf0] }
  0xdf   : > { %v943_v2 = vadd.f32 %v931_v54, %v925_v0  ;;  %1867 = vmatpush.bf16.msrb.mxu1 %v4148_v27  ;;  %v4111_v54 = vld [vmem:[%s7393_s5 + $0x2a0] sm:$0xf]  ;;  %v4099_v0 = vld [vmem:[%s7393_s5 + $0x288] sm:$0xf] }
  0xe0   : > { %v950_v6 = vmax.f32 %v942_v1, 0.0  ;;  %v4112_v49 = vor.u32 %v5089_v48, %v4111_v54  ;;  %v5086_v1 = vld [vmem:[%s7393_s5 + $0x290] sm:$0xf0]  ;;  %v4131_v40 = vld [vmem:[%s7393_s5 + $0x2c0] sm:$0xf] }
  0xe1   : > { %v951_v7 = vmax.f32 %v943_v2, 0.0  ;;  %v5064_v2 = vld [vmem:[%s7393_s5 + $0x1e4] sm:$0xf] }
  0xe2   : > { %v954_v8 = vpack.c.bf16 %v950_v6, %v946_v3  ;;  %1855 = vmatpush.bf16.msrb.mxu0 %v4040_v36  ;;  %v4004_v3 = vor.u32 %v5062_v63, %v4003_v43  ;;  %v4047_v43 = vld [vmem:[%s7393_s5 + $0x218] sm:$0xf]  ;;  %v5072_v63 = vld [vmem:[%s7393_s5 + $0x220] sm:$0xf0] }
  0xe3   : > { %v955_v14 = vpack.c.bf16 %v951_v7, %v947_v5  ;;  %1868 = vmatpush.bf16.msrb.mxu1 %v4136_v37  ;;  %v4017_v7 = vld [vmem:[%s7393_s5 + $0x1ec] sm:$0xf0] }
  0xe4   : > { %1331 = vmatmul.bf16.vlgmr.msrb.gmra.mxu2 %v954_v8 }
  0xe5   : > { %3897 = vmatmul.msk.bf16.vlgmr.msrb.gmra.mxu3 %vm562_vm0, %v955_v14 }
  0xe6   : > { %1856 = vmatpush.bf16.msrb.mxu0 %v4028_v18 }
  0xe7   : > { %1869 = vmatpush.bf16.msrb.mxu1 %v4124_v51  ;;  %v5075_v51 = vld [vmem:[%s7393_s5 + $0x238] sm:$0xf0] }
  0xea   : > { %1857 = vmatpush.bf16.msrb.mxu0 %v4016_v60 }
  0xeb   : > { %1870 = vmatpush.bf16.msrb.mxu1 %v4112_v49 }
  0xed   : > { %1373 = vmatmul.bf16.vlgmr.msra.gmra.mxu0 %v953_v62  ;;  %v5067_v62 = vld [vmem:[%s7393_s5 + $0x1fc] sm:$0xf] }
  0xee   : > { %1387 = vmatmul.bf16.vlgmr.msra.gmra.mxu1 %v954_v8  ;;  %v4032_v6 = vor.u32 %v5067_v62, %v4029_v44  ;;  %v4100_v8 = vor.u32 %v5086_v1, %v4099_v0  ;;  %1858 = vmatpush.bf16.msrb.mxu0 %v4004_v3  ;;  %v5091_v62 = vld [vmem:[%s7393_s5 + $0x2bc] sm:$0xf]  ;;  %v4143_v44 = vld [vmem:[%s7393_s5 + $0x2d8] sm:$0xf]  ;;  %v5096_v0 = vld [vmem:[%s7393_s5 + $0x2e0] sm:$0xf0] }
  0xef   : > { %v3969_v3 = vld [vmem:[%s7393_s5 + $0x18c] sm:$0xf0] }
  0xf0   : > { %1871 = vmatpush.bf16.msrb.mxu1 %v4100_v8  ;;  %v4144_v8 = vor.u32 %v5096_v0, %v4143_v44  ;;  %v5087_v44 = vld [vmem:[%s7393_s5 + $0x298] sm:$0xf0]  ;;  %v4195_v0 = vld [vmem:[%s7393_s5 + $0x48] sm:$0xf] }
  0xf4   : > { %3898 = vmatmul.msk.bf16.vlgmr.msra.gmra.mxu2 %vm562_vm0, %v955_v14  ;;  %v3991_v14 = vld [vmem:[%s7393_s5 + $0x1b0] sm:$0xf] }
  0xf5   : > { %1359 = vmatmul.bf16.vlgmr.msra.gmra.mxu3 %v952_v61  ;;  %v4044_v61 = vor.u32 %v5070_v19, %v4041_v47  ;;  %v4059_v19 = vld [vmem:[%s7393_s5 + $0x230] sm:$0xf]  ;;  %v5099_v47 = vld [vmem:[%s7393_s5 + $0x2f8] sm:$0xf0] }
  0xf6   : > { %v4060_v60 = vor.u32 %v5075_v51, %v4059_v19  ;;  %v5044_v19 = vld [vmem:[%s7393_s5 + $0x140] sm:$0xf0]  ;;  %v4023_v51 = vld [vmem:[%s7393_s5 + $0x1e8] sm:$0xf] }
 0x15a   : > { %v1304_v15 = vpop.f32.mrf.mxu0 }
 0x15b   : > { %v1318_v9 = vpop.f32.mrf.mxu1 }
 0x15c   : > { %v1319_v16 = vadd.f32 %v1318_v9, %v1304_v15  ;;  %v5059_v15 = vld [vmem:[%s7393_s5 + $0x1b8] sm:$0xf0]  ;;  %v4087_v9 = vld [vmem:[%s7393_s5 + $0x270] sm:$0xf] }
 0x15d   : > { %v3992_v17 = vor.u32 %v5059_v15, %v3991_v14  ;;  %v5088_v14 = vld [vmem:[%s7393_s5 + $0x2a4] sm:$0xf]  ;;  %v4113_v15 = vld [vmem:[%s7393_s5 + $0x2ac] sm:$0xf0] }
 0x15f   : > { %1859 = vmatpush.bf16.msrb.mxu0 %v3992_v17  ;;  %v4101_v17 = vld [vmem:[%s7393_s5 + $0x294] sm:$0xf0] }
 0x162   : > { %v1306_v12 = vpop.f32.mrf.mxu0 }
 0x163   : > { %v1320_v13 = vpop.f32.mrf.mxu1 }
 0x164   : > { %v1321_v26 = vadd.f32 %v1320_v13, %v1306_v12  ;;  %v4020_v13 = vor.u32 %v5064_v2, %v4017_v7  ;;  %v5052_v2 = vld [vmem:[%s7393_s5 + $0x184] sm:$0xf]  ;;  %v5026_v7 = vld [vmem:[%s7393_s5 + $0xb0] sm:$0xf0] }
 0x167   : > { %v1332_v10 = vpop.f32.mrf.mxu2 }
 0x168   : > { %v1346_v11 = vpop.f32.mrf.mxu3  ;;  %v1333_v4 = vadd.f32 %v1332_v10, %v1319_v16  ;;  %v5083_v10 = vld [vmem:[%s7393_s5 + $0x278] sm:$0xf0]  ;;  %v5061_v16 = vld [vmem:[%s7393_s5 + $0x1cc] sm:$0xf] }
 0x169   : > { %v4088_v25 = vor.u32 %v5083_v10, %v4087_v9  ;;  %v3972_v9 = vor.u32 %v5052_v2, %v3969_v3 }
 0x16a   : > { %v1347_v41 = vadd.f32 %v1346_v11, %v1333_v4  ;;  %v1374_v53 = vpop.f32.mrf.mxu0  ;;  %v5056_v4 = vld [vmem:[%s7393_s5 + $0x1a0] sm:$0xf0] }
 0x16b   : > { %v1388_v57 = vpop.f32.mrf.mxu1  ;;  %1872 = vmatpush.bf16.msrb.mxu1 %v4088_v25  ;;  %v4089_v25 = vld [vmem:[%s7393_s5 + $0x27c] sm:$0xf0] }
 0x16f   : > { %v1334_v29 = vpop.f32.mrf.mxu2 }
 0x170   : > { %v1348_v30 = vpop.f32.mrf.mxu3  ;;  %v1335_v34 = vadd.f32 %v1334_v29, %v1321_v26  ;;  %v3979_v26 = vld [vmem:[%s7393_s5 + $0x198] sm:$0xf]  ;;  %v5080_v29 = vld [vmem:[%s7393_s5 + $0x260] sm:$0xf0] }
 0x171   : > { %v3980_v35 = vor.u32 %v5056_v4, %v3979_v26  ;;  %v4076_v38 = vor.u32 %v5080_v29, %v4075_v28  ;;  %v5079_v4 = vld [vmem:[%s7393_s5 + $0x25c] sm:$0xf]  ;;  %v5076_v29 = vld [vmem:[%s7393_s5 + $0x244] sm:$0xf] }
 0x172   : > { %v1349_v42 = vadd.f32 %v1348_v30, %v1335_v34  ;;  %v1376_v11 = vpop.f32.mrf.mxu0  ;;  %v4008_v34 = vor.u32 %v5061_v16, %v4005_v24  ;;  %v5085_v16 = vld [vmem:[%s7393_s5 + $0x28c] sm:$0xf]  ;;  %v5082_v24 = vld [vmem:[%s7393_s5 + $0x274] sm:$0xf] }
 0x173   : > { %v1390_v27 = vpop.f32.mrf.mxu1  ;;  %1860 = vmatpush.bf16.msrb.mxu0 %v3980_v35  ;;  %1873 = vmatpush.bf16.msrb.mxu1 %v4076_v38  ;;  %v4092_v26 = vor.u32 %v5082_v24, %v4089_v25  ;;  %v4327_v35 = vld [vmem:[%s7393_s5 + $0x150] sm:$0xf]  ;;  %v4035_v38 = vld [vmem:[%s7393_s5 + $0x200] sm:$0xf]  ;;  %v5057_v24 = vld [vmem:[%s7393_s5 + $0x1a8] sm:$0xf0] }
 0x174   : > { %v1408_v46 = vpack.c.bf16 %v1349_v42, %v1347_v41  ;;  %v5094_v41 = vld [vmem:[%s7393_s5 + $0x2d4] sm:$0xf]  ;;  %v4083_v25 = vld [vmem:[%s7393_s5 + $0x260] sm:$0xf] }
 0x175   : > { %v5058_v42 = vld [vmem:[%s7393_s5 + $0x1b4] sm:$0xf] }
 0x176   : > { %v1416_v56 = vsel %vm1414_vm1, %v1408_v46, 0  ;;  %v4152_v46 = vor.u32 %v5097_v32, %v4149_v33  ;;  %v3996_v48 = vor.u32 %v5058_v42, %v3993_v45  ;;  %v5050_v32 = vld [vmem:[%s7393_s5 + $0x170] sm:$0xf0]  ;;  %v5093_v42 = vld [vmem:[%s7393_s5 + $0x2c8] sm:$0xf0] }
 0x177   : > { %1428 = vmatpush.bf16.msrb.mxu2 %v1416_v56  ;;  %v1402_v50 = vpop.f32.mrf.mxu2  ;;  %v5055_v56 = vld [vmem:[%s7393_s5 + $0x19c] sm:$0xf]  ;;  %1861 = vmatpush.bf16.msrb.mxu0 %v3968_v55  ;;  %v4219_v45 = vld [vmem:[%s7393_s5 + $0x78] sm:$0xf]  ;;  %v5066_v55 = vld [vmem:[%s7393_s5 + $0x1f0] sm:$0xf0] }
 0x178   : > { %v1360_v58 = vpop.f32.mrf.mxu3 }
 0x179   : > { %v1375_v5 = vadd.f32 %v1374_v53, %v1360_v58  ;;  %v4155_v53 = vld [vmem:[%s7393_s5 + $0x2f0] sm:$0xf] }
 0x17a   : > { %3899 = vmatmul.msk.bf16.vlgmr.msrb.gmra.mxu2 %vm1410_vm2, %v6194_v59  ;;  %v4156_v49 = vor.u32 %v5099_v47, %v4155_v53  ;;  %v4119_v53 = vld [vmem:[%s7393_s5 + $0x2a8] sm:$0xf]  ;;  %v5090_v47 = vld [vmem:[%s7393_s5 + $0x2b0] sm:$0xf0] }
 0x17b   : > { %1880 = vmatpush.bf16.msra.mxu2 %v4056_v22  ;;  %v1389_v20 = vadd.f32 %v1388_v57, %v1375_v5  ;;  %v5077_v22 = vld [vmem:[%s7393_s5 + $0x248] sm:$0xf0]  ;;  %v3981_v57 = vld [vmem:[%s7393_s5 + $0x1a4] sm:$0xf0]  ;;  %1906 = vmatpush.bf16.msra.mxu0 %v4060_v60  ;;  %v4048_v5 = vor.u32 %v5072_v63, %v4047_v43  ;;  %v5063_v43 = vld [vmem:[%s7393_s5 + $0x1d8] sm:$0xf0] }
 0x17c   : > { %v4064_v58 = vor.u32 %v5077_v22, %v4063_v21  ;;  %v3984_v1 = vor.u32 %v5055_v56, %v3981_v57  ;;  %v5020_v21 = vld [vmem:[%s7393_s5 + $0x80] sm:$0xf0]  ;;  %v4315_v22 = vld [vmem:[%s7393_s5 + $0x138] sm:$0xf]  ;;  %v4207_v56 = vld [vmem:[%s7393_s5 + $0x60] sm:$0xf] }
 0x17d   : > { %v1403_v36 = vadd.f32 %v1402_v50, %v1389_v20  ;;  %v4125_v50 = vld [vmem:[%s7393_s5 + $0x2c4] sm:$0xf0]  ;;  %v5017_v57 = vld [vmem:[%s7393_s5 + $0x68] sm:$0xf0]  ;;  %v4107_v63 = vld [vmem:[%s7393_s5 + $0x290] sm:$0xf] }
 0x17e   : > { %1874 = vmatpush.bf16.msrb.mxu1 %v4064_v58  ;;  %v4303_v58 = vld [vmem:[%s7393_s5 + $0x120] sm:$0xf]  ;;  %v4208_v60 = vor.u32 %v5017_v57, %v4207_v56  ;;  %v4108_v2 = vor.u32 %v5087_v44, %v4107_v63 }
 0x17f   : > { %1881 = vmatpush.bf16.msra.mxu2 %v4044_v61  ;;  %v1404_v31 = vpop.f32.mrf.mxu2  ;;  %v4140_v61 = vor.u32 %v5094_v41, %v4137_v52  ;;  %1907 = vmatpush.bf16.msra.mxu0 %v4048_v5  ;;  %v4036_v41 = vor.u32 %v5069_v39, %v4035_v38  ;;  %v4316_v52 = vor.u32 %v5044_v19, %v4315_v22  ;;  %v4291_v5 = vld [vmem:[%s7393_s5 + $0x108] sm:$0xf]  ;;  %v5078_v38 = vld [vmem:[%s7393_s5 + $0x250] sm:$0xf0]  ;;  %v4159_v39 = vld [vmem:[%s7393_s5] sm:$0xf] }
 0x180   : > { %v1362_v12 = vpop.f32.mrf.mxu3 }
 0x181   : > { %v1377_v23 = vadd.f32 %v1376_v11, %v1362_v12  ;;  %v4116_v11 = vor.u32 %v5088_v14, %v4113_v15  ;;  %v4231_v12 = vld [vmem:[%s7393_s5 + $0x90] sm:$0xf]  ;;  %v4095_v14 = vld [vmem:[%s7393_s5 + $0x278] sm:$0xf] }
 0x182   : > { %1919 = vmatpush.bf16.msra.mxu1 %v4156_v49  ;;  %v4011_v49 = vld [vmem:[%s7393_s5 + $0x1d0] sm:$0xf] }
 0x183   : > { %1882 = vmatpush.bf16.msra.mxu2 %v4032_v6  ;;  %v1391_v30 = vadd.f32 %v1390_v27, %v1377_v23  ;;  %v4128_v6 = vor.u32 %v5091_v62, %v4125_v50  ;;  %v4104_v23 = vor.u32 %v5085_v16, %v4101_v17  ;;  %v4077_v27 = vld [vmem:[%s7393_s5 + $0x264] sm:$0xf0]  ;;  %1908 = vmatpush.bf16.msra.mxu0 %v4036_v41  ;;  %v4279_v16 = vld [vmem:[%s7393_s5 + $0xf0] sm:$0xf]  ;;  %v5035_v17 = vld [vmem:[%s7393_s5 + $0xf8] sm:$0xf0] }
 0x184   : > { %v4080_v28 = vor.u32 %v5079_v4, %v4077_v27  ;;  %v4012_v50 = vor.u32 %v5063_v43, %v4011_v49  ;;  %v5081_v4 = vld [vmem:[%s7393_s5 + $0x268] sm:$0xf0]  ;;  %v4171_v27 = vld [vmem:[%s7393_s5 + $0x18] sm:$0xf]  ;;  %v5027_v49 = vld [vmem:[%s7393_s5 + $0xb8] sm:$0xf0] }
 0x185   : > { %v1405_v37 = vadd.f32 %v1404_v31, %v1391_v30  ;;  %v4065_v30 = vld [vmem:[%s7393_s5 + $0x24c] sm:$0xf0]  ;;  %v4339_v31 = vld [vmem:[%s7393_s5 + $0x168] sm:$0xf] }
 0x186   : > { %1920 = vmatpush.bf16.msra.mxu1 %v4144_v8  ;;  %v4068_v33 = vor.u32 %v5076_v29, %v4065_v30  ;;  %v5060_v8 = vld [vmem:[%s7393_s5 + $0x1c0] sm:$0xf0]  ;;  %v4084_v29 = vor.u32 %v5081_v4, %v4083_v25  ;;  %v4347_v43 = vld [vmem:[%s7393_s5 + $0x170] sm:$0xf]  ;;  %v4317_v4 = vld [vmem:[%s7393_s5 + $0x144] sm:$0xf0] }
 0x187   : > { %1883 = vmatpush.bf16.msra.mxu2 %v4020_v13  ;;  %v1409_v18 = vpack.c.bf16 %v1405_v37, %v1403_v36  ;;  %v5023_v13 = vld [vmem:[%s7393_s5 + $0x98] sm:$0xf0] }
 0x188   : > { %v4232_v20 = vor.u32 %v5023_v13, %v4231_v12  ;;  %v5047_v36 = vld [vmem:[%s7393_s5 + $0x158] sm:$0xf0] }
 0x189   : > { %v1419_v54 = vsel %vm1414_vm1, %v1409_v18, 0  ;;  %v4328_v37 = vor.u32 %v5047_v36, %v4327_v35  ;;  %v4132_v18 = vor.u32 %v5093_v42, %v4131_v40  ;;  %v5054_v35 = vld [vmem:[%s7393_s5 + $0x190] sm:$0xf0]  ;;  %v4071_v36 = vld [vmem:[%s7393_s5 + $0x248] sm:$0xf] }
 0x18a   : > { %1441 = vmatpush.bf16.msrb.mxu3 %v1419_v54  ;;  %v4024_v54 = vor.u32 %v5066_v55, %v4023_v51  ;;  %v5005_v40 = vld [vmem:[%s7393_s5 + $0x8] sm:$0xf0]  ;;  %v4072_v41 = vor.u32 %v5078_v38, %v4071_v36  ;;  %v4305_v38 = vld [vmem:[%s7393_s5 + $0x12c] sm:$0xf0] }
 0x18b   : > { %1884 = vmatpush.bf16.msra.mxu2 %v4008_v34  ;;  %v4340_v34 = vor.u32 %v5050_v32, %v4339_v31  ;;  %1921 = vmatpush.bf16.msra.mxu1 %v4132_v18  ;;  %v4267_v31 = vld [vmem:[%s7393_s5 + $0xd8] sm:$0xf]  ;;  %v5032_v32 = vld [vmem:[%s7393_s5 + $0xe0] sm:$0xf0]  ;;  %v4160_v42 = vor.u32 %v5005_v40, %v4159_v39  ;;  %v4215_v39 = vld [vmem:[%s7393_s5 + $0x68] sm:$0xf] }
 0x18c   : > { %1909 = vmatpush.bf16.msra.mxu0 %v4024_v54  ;;  %v5025_v54 = vld [vmem:[%s7393_s5 + $0xac] sm:$0xf]  ;;  %v5018_v40 = vld [vmem:[%s7393_s5 + $0x70] sm:$0xf0] }
 0x18d   : > { %3900 = vmatmul.msk.bf16.vlgmr.msrb.gmra.mxu3 %vm1410_vm2, %v6194_v59  ;;  %v4243_v59 = vld [vmem:[%s7393_s5 + $0xa8] sm:$0xf] }
 0x18e   : > { %1893 = vmatpush.bf16.msra.mxu3 %v4152_v46  ;;  %v4244_v10 = vor.u32 %v5026_v7, %v4243_v59  ;;  %v4220_v46 = vor.u32 %v5020_v21, %v4219_v45  ;;  %v3999_v7 = vld [vmem:[%s7393_s5 + $0x1b8] sm:$0xf]  ;;  %v4255_v45 = vld [vmem:[%s7393_s5 + $0xc0] sm:$0xf]  ;;  %v5029_v21 = vld [vmem:[%s7393_s5 + $0xc8] sm:$0xf0] }
 0x18f   : > { %1885 = vmatpush.bf16.msra.mxu2 %v3996_v48  ;;  %v4120_v48 = vor.u32 %v5090_v47, %v4119_v53  ;;  %v4000_v15 = vor.u32 %v5060_v8, %v3999_v7  ;;  %v4256_v18 = vor.u32 %v5029_v21, %v4255_v45  ;;  %v4233_v7 = vld [vmem:[%s7393_s5 + $0x9c] sm:$0xf0] }
 0x190   : > { %1910 = vmatpush.bf16.msra.mxu0 %v4012_v50 }
 0x191   : > { %1922 = vmatpush.bf16.msra.mxu1 %v4120_v48  ;;  %v4245_v48 = vld [vmem:[%s7393_s5 + $0xb4] sm:$0xf0] }
 0x192   : > { %1894 = vmatpush.bf16.msra.mxu3 %v4140_v61  ;;  %v5041_v61 = vld [vmem:[%s7393_s5 + $0x128] sm:$0xf0] }
 0x193   : > { %1886 = vmatpush.bf16.msra.mxu2 %v3984_v1  ;;  %v4304_v62 = vor.u32 %v5041_v61, %v4303_v58  ;;  %v5014_v1 = vld [vmem:[%s7393_s5 + $0x50] sm:$0xf0]  ;;  %v5049_v58 = vld [vmem:[%s7393_s5 + $0x16c] sm:$0xf] }
 0x194   : > { %v4196_v3 = vor.u32 %v5014_v1, %v4195_v0  ;;  %1911 = vmatpush.bf16.msra.mxu0 %v4000_v15  ;;  %v5051_v1 = vld [vmem:[%s7393_s5 + $0x178] sm:$0xf0]  ;;  %v5046_v15 = vld [vmem:[%s7393_s5 + $0x154] sm:$0xf] }
 0x195   : > { %1923 = vmatpush.bf16.msra.mxu1 %v4108_v2 }
 0x196   : > { %1895 = vmatpush.bf16.msra.mxu3 %v4128_v6  ;;  %v5038_v6 = vld [vmem:[%s7393_s5 + $0x110] sm:$0xf0] }
 0x197   : > { %1887 = vmatpush.bf16.msra.mxu2 %v3972_v9  ;;  %v4292_v59 = vor.u32 %v5038_v6, %v4291_v5  ;;  %v5084_v9 = vld [vmem:[%s7393_s5 + $0x280] sm:$0xf0]  ;;  %v4248_v5 = vor.u32 %v5025_v54, %v4245_v48  ;;  %v5015_v54 = vld [vmem:[%s7393_s5 + $0x58] sm:$0xf0]  ;;  %v4299_v48 = vld [vmem:[%s7393_s5 + $0x110] sm:$0xf] }
 0x198   : > { %v4096_v12 = vor.u32 %v5084_v9, %v4095_v14  ;;  %v4348_v14 = vor.u32 %v5051_v1, %v4347_v43  ;;  %v4329_v9 = vld [vmem:[%s7393_s5 + $0x15c] sm:$0xf0]  ;;  %v5034_v43 = vld [vmem:[%s7393_s5 + $0xf4] sm:$0xf]  ;;  %v5036_v1 = vld [vmem:[%s7393_s5 + $0x100] sm:$0xf0] }
 0x19a   : > { %1896 = vmatpush.bf16.msra.mxu3 %v4116_v11  ;;  %v5011_v11 = vld [vmem:[%s7393_s5 + $0x38] sm:$0xf0]  ;;  %1924 = vmatpush.bf16.msra.mxu1 %v4096_v12  ;;  %v4335_v12 = vld [vmem:[%s7393_s5 + $0x158] sm:$0xf] }
 0x19b   : > { %2190 = vmatpush.bf16.msrb.mxu2 %v4244_v10  ;;  %v4183_v10 = vld [vmem:[%s7393_s5 + $0x30] sm:$0xf] }
 0x19c   : > { %v4184_v13 = vor.u32 %v5011_v11, %v4183_v10  ;;  %v4239_v10 = vld [vmem:[%s7393_s5 + $0x98] sm:$0xf]  ;;  %v5024_v11 = vld [vmem:[%s7393_s5 + $0xa0] sm:$0xf0] }
 0x19e   : > { %1897 = vmatpush.bf16.msra.mxu3 %v4104_v23  ;;  %v3987_v23 = vld [vmem:[%s7393_s5 + $0x1a0] sm:$0xf]  ;;  %1925 = vmatpush.bf16.msra.mxu1 %v4084_v29 }
 0x19f   : > { %2191 = vmatpush.bf16.msrb.mxu2 %v4232_v20  ;;  %v4280_v20 = vor.u32 %v5035_v17, %v4279_v16  ;;  %v4332_v17 = vor.u32 %v5046_v15, %v4329_v9  ;;  %v4323_v29 = vld [vmem:[%s7393_s5 + $0x140] sm:$0xf]  ;;  %v5009_v9 = vld [vmem:[%s7393_s5 + $0x28] sm:$0xf0] }
 0x1a0   : > { %v4179_v15 = vld [vmem:[%s7393_s5 + $0x20] sm:$0xf] }
 0x1a2   : > { %1898 = vmatpush.bf16.msra.mxu3 %v4092_v26  ;;  %v3988_v26 = vor.u32 %v5057_v24, %v3987_v23  ;;  %1926 = vmatpush.bf16.msra.mxu1 %v4072_v41  ;;  %v4221_v23 = vld [vmem:[%s7393_s5 + $0x84] sm:$0xf0]  ;;  %v4240_v24 = vor.u32 %v5024_v11, %v4239_v10  ;;  %v4275_v10 = vld [vmem:[%s7393_s5 + $0xe0] sm:$0xf]  ;;  %v5033_v11 = vld [vmem:[%s7393_s5 + $0xe8] sm:$0xf0] }
 0x1a3   : > { %2192 = vmatpush.bf16.msrb.mxu2 %v4220_v46  ;;  %v4311_v41 = vld [vmem:[%s7393_s5 + $0x128] sm:$0xf] }
 0x1a4   : > { %1912 = vmatpush.bf16.msra.mxu0 %v3988_v26  ;;  %v5043_v26 = vld [vmem:[%s7393_s5 + $0x13c] sm:$0xf] }
 0x1a6   : > { %1899 = vmatpush.bf16.msra.mxu3 %v4080_v28  ;;  %v5008_v28 = vld [vmem:[%s7393_s5 + $0x20] sm:$0xf0] }
 0x1a7   : > { %2193 = vmatpush.bf16.msrb.mxu2 %v4208_v60  ;;  %v4172_v30 = vor.u32 %v5008_v28, %v4171_v27  ;;  %v4341_v60 = vld [vmem:[%s7393_s5 + $0x174] sm:$0xf0]  ;;  %v4227_v27 = vld [vmem:[%s7393_s5 + $0x80] sm:$0xf]  ;;  %v5021_v28 = vld [vmem:[%s7393_s5 + $0x88] sm:$0xf0] }
 0x1a8   : > { %v4344_v6 = vor.u32 %v5049_v58, %v4341_v60  ;;  %v5010_v60 = vld [vmem:[%s7393_s5 + $0x34] sm:$0xf] }
 0x1aa   : > { %1900 = vmatpush.bf16.msra.mxu3 %v4068_v33  ;;  %v4268_v33 = vor.u32 %v5032_v32, %v4267_v31  ;;  %v4320_v32 = vor.u32 %v5043_v26, %v4317_v4  ;;  %v4167_v26 = vld [vmem:[%s7393_s5 + $0x8] sm:$0xf]  ;;  %v5006_v4 = vld [vmem:[%s7393_s5 + $0x10] sm:$0xf0] }
 0x1ab   : > { %2194 = vmatpush.bf16.msrb.mxu2 %v4196_v3 }
 0x1ae   : > { %2203 = vmatpush.bf16.msrb.mxu3 %v4340_v34  ;;  %v3975_v34 = vld [vmem:[%s7393_s5 + $0x188] sm:$0xf] }
 0x1af   : > { %2195 = vmatpush.bf16.msrb.mxu2 %v4184_v13  ;;  %v5048_v13 = vld [vmem:[%s7393_s5 + $0x160] sm:$0xf0] }
 0x1b0   : > { %v4336_v25 = vor.u32 %v5048_v13, %v4335_v12  ;;  %v5004_v12 = vld [vmem:[%s7393_s5 + $0x4] sm:$0xf] }
 0x1b2   : > { %2204 = vmatpush.bf16.msrb.mxu3 %v4328_v37  ;;  %v3976_v37 = vor.u32 %v5054_v35, %v3975_v34  ;;  %v4209_v34 = vld [vmem:[%s7393_s5 + $0x6c] sm:$0xf0]  ;;  %v4228_v35 = vor.u32 %v5021_v28, %v4227_v27  ;;  %v4263_v27 = vld [vmem:[%s7393_s5 + $0xc8] sm:$0xf]  ;;  %v5030_v28 = vld [vmem:[%s7393_s5 + $0xd0] sm:$0xf0] }
 0x1b3   : > { %2196 = vmatpush.bf16.msrb.mxu2 %v4172_v30  ;;  %v5045_v30 = vld [vmem:[%s7393_s5 + $0x148] sm:$0xf0] }
 0x1b4   : > { %1913 = vmatpush.bf16.msra.mxu0 %v3976_v37  ;;  %v4324_v36 = vor.u32 %v5045_v30, %v4323_v29  ;;  %v5040_v37 = vld [vmem:[%s7393_s5 + $0x124] sm:$0xf]  ;;  %v4499_v29 = vld [vmem:[%s7393_s5 + $0x3a8] sm:$0xf]  ;;  %v5122_v30 = vld [vmem:[%s7393_s5 + $0x3b0] sm:$0xf0] }
 0x1b5   : > { %v4308_v21 = vor.u32 %v5040_v37, %v4305_v38  ;;  %v5145_v37 = vld [vmem:[%s7393_s5 + $0x46c] sm:$0xf]  ;;  %v4597_v38 = vld [vmem:[%s7393_s5 + $0x474] sm:$0xf0] }
 0x1b6   : > { %2205 = vmatpush.bf16.msrb.mxu3 %v4316_v52 }
 0x1b7   : > { %2197 = vmatpush.bf16.msrb.mxu2 %v4160_v42  ;;  %v5042_v42 = vld [vmem:[%s7393_s5 + $0x130] sm:$0xf0] }
 0x1ba   : > { %2206 = vmatpush.bf16.msrb.mxu3 %v4304_v62  ;;  %v4251_v62 = vld [vmem:[%s7393_s5 + $0xb0] sm:$0xf] }
 0x1bb   : > { %v4252_v8 = vor.u32 %v5027_v49, %v4251_v62 }
 0x1be   : > { %2207 = vmatpush.bf16.msrb.mxu3 %v4292_v59  ;;  %v5022_v59 = vld [vmem:[%s7393_s5 + $0x94] sm:$0xf] }
 0x1bf   : > { %v4236_v16 = vor.u32 %v5022_v59, %v4233_v7 }
 0x1c2   : > { %2208 = vmatpush.bf16.msrb.mxu3 %v4280_v20  ;;  %v5019_v20 = vld [vmem:[%s7393_s5 + $0x7c] sm:$0xf] }
 0x1c3   : > { %v4224_v31 = vor.u32 %v5019_v20, %v4221_v23  ;;  %v5028_v20 = vld [vmem:[%s7393_s5 + $0xc4] sm:$0xf]  ;;  %v4257_v23 = vld [vmem:[%s7393_s5 + $0xcc] sm:$0xf0] }
 0x1c6   : > { %2209 = vmatpush.bf16.msrb.mxu3 %v4268_v33  ;;  %v5016_v33 = vld [vmem:[%s7393_s5 + $0x64] sm:$0xf] }
 0x1c7   : > { %v4212_v45 = vor.u32 %v5016_v33, %v4209_v34  ;;  %v5121_v33 = vld [vmem:[%s7393_s5 + $0x3ac] sm:$0xf] }
 0x1ca   : > { %2210 = vmatpush.bf16.msrb.mxu3 %v4256_v18  ;;  %v5013_v18 = vld [vmem:[%s7393_s5 + $0x4c] sm:$0xf] }
 0x1fd   : > { %v1430_v46 = vpop.f32.mrf.mxu2 }
 0x205   : > { %v1432_v22 = vpop.f32.mrf.mxu2 }
 0x206   : > { %v4216_v22 = vor.u32 %v5018_v40, %v4215_v39  ;;  %v4168_v39 = vor.u32 %v5006_v4, %v4167_v26  ;;  %v4264_v40 = vor.u32 %v5030_v28, %v4263_v27  ;;  %v5133_v26 = vld [vmem:[%s7393_s5 + $0x40c] sm:$0xf]  ;;  %v4549_v4 = vld [vmem:[%s7393_s5 + $0x414] sm:$0xf0] }
 0x210   : > { %v1443_v19 = vpop.f32.mrf.mxu3 }
 0x211   : > { %v1447_v51 = vpack.c.bf16 %v1443_v19, %v1430_v46  ;;  %v4197_v46 = vld [vmem:[%s7393_s5 + $0x54] sm:$0xf0]  ;;  %v4312_v19 = vor.u32 %v5042_v42, %v4311_v41  ;;  %v4500_v41 = vor.u32 %v5122_v30, %v4499_v29  ;;  %v4439_v29 = vld [vmem:[%s7393_s5 + $0x330] sm:$0xf]  ;;  %v5107_v30 = vld [vmem:[%s7393_s5 + $0x338] sm:$0xf0] }
 0x213   : > { %v1578_v52 = vunpack.c.l.b16 %v1447_v51  ;;  %v1579_v55 = vunpack.c.h.b16 %v1447_v51  ;;  %v5037_v51 = vld [vmem:[%s7393_s5 + $0x10c] sm:$0xf] }
 0x215   : > { %v6525_v53 = vpack.c.b16 %v1578_v52, %v1578_v52  ;;  %v6527_v47 = vpack.c.b16 %v1579_v55, %v1579_v55  ;;  %v4293_v52 = vld [vmem:[%s7393_s5 + $0x114] sm:$0xf0]  ;;  %v4203_v55 = vld [vmem:[%s7393_s5 + $0x50] sm:$0xf] }
 0x216   : > { %v4296_v58 = vor.u32 %v5037_v51, %v4293_v52  ;;  %v4204_v62 = vor.u32 %v5015_v54, %v4203_v55  ;;  %v5118_v51 = vld [vmem:[%s7393_s5 + $0x394] sm:$0xf]  ;;  %v4489_v52 = vld [vmem:[%s7393_s5 + $0x39c] sm:$0xf0] }
 0x217   : > { %v1585_v56 = vshll.u32 %v6525_v53, 16  ;;  %v1592_v57 = vshll.u32 %v6527_v47, 16  ;;  %v1583_v63 = vshrl.u32 %v6525_v53, 16  ;;  %v1590_v44 = vshrl.u32 %v6527_v47, 16  ;;  %v5142_v55 = vld [vmem:[%s7393_s5 + $0x454] sm:$0xf] }
 0x218   : > { %v1445_v61 = vpop.f32.mrf.mxu3  ;;  %v4585_v54 = vld [vmem:[%s7393_s5 + $0x45c] sm:$0xf0] }
 0x219   : > { %v1587_v50 = vrot.slane %v1585_v56, 1  ;;  %v1594_v0 = vrot.slane %v1592_v57, 1  ;;  %v5039_v56 = vld [vmem:[%s7393_s5 + $0x118] sm:$0xf0]  ;;  %v4200_v57 = vor.u32 %v5013_v18, %v4197_v46  ;;  %v4185_v61 = vld [vmem:[%s7393_s5 + $0x3c] sm:$0xf0]  ;;  %v4600_v46 = vor.u32 %v5145_v37, %v4597_v38 }
 0x21a   : > { %v4300_v49 = vor.u32 %v5039_v56, %v4299_v48  ;;  %v5130_v37 = vld [vmem:[%s7393_s5 + $0x3f4] sm:$0xf]  ;;  %v4537_v38 = vld [vmem:[%s7393_s5 + $0x3fc] sm:$0xf0] }
 0x21b   : > { %v6557_v2 = vor.u32 %v1587_v50, %v1583_v63  ;;  %v6559_v3 = vor.u32 %v1594_v0, %v1590_v44  ;;  %v4281_v63 = vld [vmem:[%s7393_s5 + $0xfc] sm:$0xf0]  ;;  %v4191_v50 = vld [vmem:[%s7393_s5 + $0x38] sm:$0xf]  ;;  %v5012_v44 = vld [vmem:[%s7393_s5 + $0x40] sm:$0xf0] }
 0x21c   : > { %v4287_v0 = vld [vmem:[%s7393_s5 + $0xf8] sm:$0xf]  ;;  %v4192_v59 = vor.u32 %v5012_v44, %v4191_v50  ;;  %v5139_v50 = vld [vmem:[%s7393_s5 + $0x43c] sm:$0xf]  ;;  %v4573_v44 = vld [vmem:[%s7393_s5 + $0x444] sm:$0xf0] }
 0x21d   : > { %1862 = vmatmul.bf16.vlgmr.msrb.gmra.mxu0 %v6557_v2  ;;  %1875 = vmatmul.bf16.vlgmr.msrb.gmra.mxu1 %v6559_v3  ;;  %v4288_v7 = vor.u32 %v5036_v1, %v4287_v0 }
 0x21e   : > { %1888 = vmatmul.bf16.vlgmr.msra.gmra.mxu2 %v6557_v2  ;;  %1901 = vmatmul.bf16.vlgmr.msra.gmra.mxu3 %v6559_v3 }
 0x21f   : > { %2216 = vmatpush.bf16.msrb.mxu0 %v4248_v5  ;;  %2229 = vmatpush.bf16.msrb.mxu1 %v4344_v6  ;;  %v5007_v5 = vld [vmem:[%s7393_s5 + $0x1c] sm:$0xf]  ;;  %v4173_v6 = vld [vmem:[%s7393_s5 + $0x24] sm:$0xf0] }
 0x220   : > { %2242 = vmatpush.bf16.msra.mxu2 %v4252_v8  ;;  %2255 = vmatpush.bf16.msra.mxu3 %v4348_v14  ;;  %v5031_v8 = vld [vmem:[%s7393_s5 + $0xdc] sm:$0xf]  ;;  %v4269_v14 = vld [vmem:[%s7393_s5 + $0xe4] sm:$0xf0]  ;;  %v4176_v13 = vor.u32 %v5007_v5, %v4173_v6  ;;  %v4576_v6 = vor.u32 %v5139_v50, %v4573_v44  ;;  %v4507_v50 = vld [vmem:[%s7393_s5 + $0x3b0] sm:$0xf] }
 0x221   : > { %v5123_v44 = vld [vmem:[%s7393_s5 + $0x3b8] sm:$0xf0] }
 0x223   : > { %2217 = vmatpush.bf16.msrb.mxu0 %v4236_v16  ;;  %2230 = vmatpush.bf16.msrb.mxu1 %v4332_v17  ;;  %v4272_v16 = vor.u32 %v5031_v8, %v4269_v14  ;;  %v4161_v17 = vld [vmem:[%s7393_s5 + $0xc] sm:$0xf0]  ;;  %v5112_v8 = vld [vmem:[%s7393_s5 + $0x364] sm:$0xf] }
 0x224   : > { %2243 = vmatpush.bf16.msra.mxu2 %v4240_v24  ;;  %2256 = vmatpush.bf16.msra.mxu3 %v4336_v25  ;;  %v4180_v24 = vor.u32 %v5009_v9, %v4179_v15  ;;  %v4276_v25 = vor.u32 %v5033_v11, %v4275_v10  ;;  %v4164_v34 = vor.u32 %v5004_v12, %v4161_v17  ;;  %v4465_v14 = vld [vmem:[%s7393_s5 + $0x36c] sm:$0xf0]  ;;  %v5136_v15 = vld [vmem:[%s7393_s5 + $0x424] sm:$0xf]  ;;  %v4451_v12 = vld [vmem:[%s7393_s5 + $0x348] sm:$0xf] }
 0x225   : > { %v4561_v9 = vld [vmem:[%s7393_s5 + $0x42c] sm:$0xf0] }
 0x226   : > { %v4564_v17 = vor.u32 %v5136_v15, %v4561_v9  ;;  %v4591_v15 = vld [vmem:[%s7393_s5 + $0x458] sm:$0xf]  ;;  %v5144_v9 = vld [vmem:[%s7393_s5 + $0x460] sm:$0xf0] }
 0x227   : > { %2218 = vmatpush.bf16.msrb.mxu0 %v4224_v31  ;;  %2231 = vmatpush.bf16.msrb.mxu1 %v4320_v32  ;;  %v4595_v31 = vld [vmem:[%s7393_s5 + $0x468] sm:$0xf]  ;;  %v5146_v32 = vld [vmem:[%s7393_s5 + $0x470] sm:$0xf0] }
 0x228   : > { %2244 = vmatpush.bf16.msra.mxu2 %v4228_v35  ;;  %2257 = vmatpush.bf16.msra.mxu3 %v4324_v36  ;;  %v4260_v35 = vor.u32 %v5028_v20, %v4257_v23  ;;  %v4501_v36 = vld [vmem:[%s7393_s5 + $0x3b4] sm:$0xf0]  ;;  %v4596_v42 = vor.u32 %v5146_v32, %v4595_v31  ;;  %v4547_v20 = vld [vmem:[%s7393_s5 + $0x408] sm:$0xf]  ;;  %v5134_v23 = vld [vmem:[%s7393_s5 + $0x410] sm:$0xf0]  ;;  %v4552_v32 = vor.u32 %v5133_v26, %v4549_v4 }
 0x229   : > { %v4504_v18 = vor.u32 %v5121_v33, %v4501_v36  ;;  %v4548_v28 = vor.u32 %v5134_v23, %v4547_v20  ;;  %v4535_v33 = vld [vmem:[%s7393_s5 + $0x3f0] sm:$0xf]  ;;  %v4441_v36 = vld [vmem:[%s7393_s5 + $0x33c] sm:$0xf0]  ;;  %v4567_v26 = vld [vmem:[%s7393_s5 + $0x428] sm:$0xf] }
 0x22a   : > { %v5138_v4 = vld [vmem:[%s7393_s5 + $0x430] sm:$0xf0] }
 0x22b   : > { %2219 = vmatpush.bf16.msrb.mxu0 %v4212_v45  ;;  %2232 = vmatpush.bf16.msrb.mxu1 %v4308_v21  ;;  %v4487_v45 = vld [vmem:[%s7393_s5 + $0x390] sm:$0xf]  ;;  %v5119_v21 = vld [vmem:[%s7393_s5 + $0x398] sm:$0xf0] }
 0x22c   : > { %2245 = vmatpush.bf16.msra.mxu2 %v4216_v22  ;;  %2258 = vmatpush.bf16.msra.mxu3 %v4312_v19  ;;  %v4583_v22 = vld [vmem:[%s7393_s5 + $0x450] sm:$0xf]  ;;  %v5143_v19 = vld [vmem:[%s7393_s5 + $0x458] sm:$0xf0]  ;;  %v4488_v48 = vor.u32 %v5119_v21, %v4487_v45  ;;  %v4540_v21 = vor.u32 %v5130_v37, %v4537_v38  ;;  %v4543_v37 = vld [vmem:[%s7393_s5 + $0x3f8] sm:$0xf] }
 0x22d   : > { %1914 = vmatmul.bf16.vlgmr.msra.gmra.mxu0 %v6557_v2  ;;  %1927 = vmatmul.bf16.vlgmr.msra.gmra.mxu1 %v6559_v3  ;;  %v4188_v2 = vor.u32 %v5010_v60, %v4185_v61  ;;  %v4284_v3 = vor.u32 %v5034_v43, %v4281_v63  ;;  %v4584_v56 = vor.u32 %v5143_v19, %v4583_v22  ;;  %v5115_v43 = vld [vmem:[%s7393_s5 + $0x37c] sm:$0xf]  ;;  %v4477_v63 = vld [vmem:[%s7393_s5 + $0x384] sm:$0xf0]  ;;  %v5132_v38 = vld [vmem:[%s7393_s5 + $0x400] sm:$0xf0] }
 0x22e   : > { %2198 = vmatmul.bf16.vlgmr.msrb.gmra.mxu2 %v6525_v53  ;;  %2211 = vmatmul.bf16.vlgmr.msrb.gmra.mxu3 %v6527_v47  ;;  %v4492_v60 = vor.u32 %v5118_v51, %v4489_v52  ;;  %v4588_v61 = vor.u32 %v5142_v55, %v4585_v54  ;;  %v4480_v5 = vor.u32 %v5115_v43, %v4477_v63  ;;  %v5103_v22 = vld [vmem:[%s7393_s5 + $0x31c] sm:$0xf]  ;;  %v4429_v19 = vld [vmem:[%s7393_s5 + $0x324] sm:$0xf0]  ;;  %v5124_v43 = vld [vmem:[%s7393_s5 + $0x3c4] sm:$0xf] }
 0x22f   : > { %2220 = vmatpush.bf16.msrb.mxu0 %v4200_v57  ;;  %2233 = vmatpush.bf16.msrb.mxu1 %v4296_v58  ;;  %v4475_v57 = vld [vmem:[%s7393_s5 + $0x378] sm:$0xf]  ;;  %v5116_v58 = vld [vmem:[%s7393_s5 + $0x380] sm:$0xf0]  ;;  %v5127_v51 = vld [vmem:[%s7393_s5 + $0x3dc] sm:$0xf] }
 0x230   : > { %2246 = vmatpush.bf16.msra.mxu2 %v4204_v62  ;;  %2259 = vmatpush.bf16.msra.mxu3 %v4300_v49  ;;  %v4571_v62 = vld [vmem:[%s7393_s5 + $0x438] sm:$0xf]  ;;  %v5140_v49 = vld [vmem:[%s7393_s5 + $0x440] sm:$0xf0]  ;;  %v4476_v0 = vor.u32 %v5116_v58, %v4475_v57  ;;  %v4525_v52 = vld [vmem:[%s7393_s5 + $0x3e4] sm:$0xf0]  ;;  %v4432_v58 = vor.u32 %v5103_v22, %v4429_v19 }
 0x231   : > { %v4572_v1 = vor.u32 %v5140_v49, %v4571_v62  ;;  %v4511_v57 = vld [vmem:[%s7393_s5 + $0x3c0] sm:$0xf]  ;;  %v5100_v62 = vld [vmem:[%s7393_s5 + $0x304] sm:$0xf]  ;;  %v4417_v49 = vld [vmem:[%s7393_s5 + $0x30c] sm:$0xf0] }
 0x232   : > { %v4513_v63 = vld [vmem:[%s7393_s5 + $0x3cc] sm:$0xf0]  ;;  %v4423_v22 = vld [vmem:[%s7393_s5 + $0x308] sm:$0xf]  ;;  %v5102_v19 = vld [vmem:[%s7393_s5 + $0x310] sm:$0xf0] }
 0x233   : > { %2221 = vmatpush.bf16.msrb.mxu0 %v4188_v2  ;;  %2234 = vmatpush.bf16.msrb.mxu1 %v4284_v3  ;;  %v4463_v2 = vld [vmem:[%s7393_s5 + $0x360] sm:$0xf]  ;;  %v5113_v3 = vld [vmem:[%s7393_s5 + $0x368] sm:$0xf0] }
 0x234   : > { %2247 = vmatpush.bf16.msra.mxu2 %v4192_v59  ;;  %2260 = vmatpush.bf16.msra.mxu3 %v4288_v7  ;;  %v4559_v59 = vld [vmem:[%s7393_s5 + $0x420] sm:$0xf]  ;;  %v5137_v7 = vld [vmem:[%s7393_s5 + $0x428] sm:$0xf0]  ;;  %v4464_v10 = vor.u32 %v5113_v3, %v4463_v2 }
 0x235   : > { %v4560_v11 = vor.u32 %v5137_v7, %v4559_v59  ;;  %v4508_v59 = vor.u32 %v5123_v44, %v4507_v50 }
 0x237   : > { %2222 = vmatpush.bf16.msrb.mxu0 %v4176_v13  ;;  %2235 = vmatpush.bf16.msrb.mxu1 %v4272_v16  ;;  %v5110_v13 = vld [vmem:[%s7393_s5 + $0x350] sm:$0xf0]  ;;  %v4468_v16 = vor.u32 %v5112_v8, %v4465_v14  ;;  %v4495_v8 = vld [vmem:[%s7393_s5 + $0x398] sm:$0xf]  ;;  %v5120_v14 = vld [vmem:[%s7393_s5 + $0x3a0] sm:$0xf0] }
 0x238   : > { %2248 = vmatpush.bf16.msra.mxu2 %v4180_v24  ;;  %2261 = vmatpush.bf16.msra.mxu3 %v4276_v25  ;;  %v5109_v24 = vld [vmem:[%s7393_s5 + $0x34c] sm:$0xf]  ;;  %v4453_v25 = vld [vmem:[%s7393_s5 + $0x354] sm:$0xf0]  ;;  %v4452_v27 = vor.u32 %v5110_v13, %v4451_v12  ;;  %v4496_v12 = vor.u32 %v5120_v14, %v4495_v8  ;;  %v4592_v13 = vor.u32 %v5144_v9, %v4591_v15  ;;  %v5160_v9 = vld [vmem:[%s7395_s7 + $0x60] sm:$0xff] }
 0x239   : > { %v4456_v31 = vor.u32 %v5109_v24, %v4453_v25  ;;  %v4471_v24 = vld [vmem:[%s7393_s5 + $0x368] sm:$0xf]  ;;  %v5114_v25 = vld [vmem:[%s7393_s5 + $0x370] sm:$0xf0]  ;;  %v5151_v15 = vld [vmem:[%s7395_s7 + $0x18] sm:$0xff] }
 0x23b   : > { %2223 = vmatpush.bf16.msrb.mxu0 %v4164_v34  ;;  %2236 = vmatpush.bf16.msrb.mxu1 %v4260_v35  ;;  %v5131_v34 = vld [vmem:[%s7393_s5 + $0x3f8] sm:$0xf0]  ;;  %v5106_v35 = vld [vmem:[%s7393_s5 + $0x334] sm:$0xf] }
 0x23c   : > { %2249 = vmatpush.bf16.msra.mxu2 %v4168_v39  ;;  %2262 = vmatpush.bf16.msra.mxu3 %v4264_v40  ;;  %v4440_v39 = vor.u32 %v5107_v30, %v4439_v29  ;;  %v4536_v40 = vor.u32 %v5131_v34, %v4535_v33  ;;  %v4444_v45 = vor.u32 %v5106_v35, %v4441_v36  ;;  %v4459_v29 = vld [vmem:[%s7393_s5 + $0x350] sm:$0xf]  ;;  %v5111_v30 = vld [vmem:[%s7393_s5 + $0x358] sm:$0xf0]  ;;  %v4447_v35 = vld [vmem:[%s7393_s5 + $0x338] sm:$0xf] }
 0x23d   : > { %v4460_v33 = vor.u32 %v5111_v30, %v4459_v29  ;;  %v5108_v36 = vld [vmem:[%s7393_s5 + $0x340] sm:$0xf0]  ;;  %v5167_v30 = vld [vmem:[%s7395_s7 + $0x98] sm:$0xff] }
 0x23e   : > { %2224 = vmatmul.bf16.vlgmr.msrb.gmra.mxu0 %v6525_v53  ;;  %2237 = vmatmul.bf16.vlgmr.msrb.gmra.mxu1 %v6527_v47 }
 0x23f   : > { %2593 = vmatpush.bf16.msra.mxu0 %v4500_v41  ;;  %2606 = vmatpush.bf16.msra.mxu1 %v4596_v42  ;;  %v4427_v41 = vld [vmem:[%s7393_s5 + $0x318] sm:$0xf]  ;;  %v5104_v42 = vld [vmem:[%s7393_s5 + $0x320] sm:$0xf0] }
 0x240   : > { %2619 = vmatpush.bf16.msrb.mxu2 %v4504_v18  ;;  %2632 = vmatpush.bf16.msrb.mxu3 %v4600_v46  ;;  %v4523_v18 = vld [vmem:[%s7393_s5 + $0x3d8] sm:$0xf]  ;;  %v5128_v46 = vld [vmem:[%s7393_s5 + $0x3e0] sm:$0xf0]  ;;  %v4428_v55 = vor.u32 %v5104_v42, %v4427_v41  ;;  %v4435_v41 = vld [vmem:[%s7393_s5 + $0x320] sm:$0xf] }
 0x241   : > { %2250 = vmatmul.bf16.vlgmr.msra.gmra.mxu2 %v6525_v53  ;;  %2263 = vmatmul.bf16.vlgmr.msra.gmra.mxu3 %v6527_v47  ;;  %v4524_v54 = vor.u32 %v5128_v46, %v4523_v18  ;;  %v5105_v42 = vld [vmem:[%s7393_s5 + $0x328] sm:$0xf0] }
 0x242   : > { %v4436_v18 = vor.u32 %v5105_v42, %v4435_v41 }
 0x243   : > { %2594 = vmatpush.bf16.msra.mxu0 %v4488_v48  ;;  %2607 = vmatpush.bf16.msra.mxu1 %v4584_v56  ;;  %v4415_v48 = vld [vmem:[%s7393_s5 + $0x300] sm:$0xf]  ;;  %v5101_v56 = vld [vmem:[%s7393_s5 + $0x308] sm:$0xf0] }
 0x244   : > { %2620 = vmatpush.bf16.msrb.mxu2 %v4492_v60  ;;  %2633 = vmatpush.bf16.msrb.mxu3 %v4588_v61  ;;  %v4528_v60 = vor.u32 %v5127_v51, %v4525_v52  ;;  %v5125_v61 = vld [vmem:[%s7393_s5 + $0x3c8] sm:$0xf0]  ;;  %v4416_v2 = vor.u32 %v5101_v56, %v4415_v48  ;;  %v4519_v51 = vld [vmem:[%s7393_s5 + $0x3c8] sm:$0xf]  ;;  %v5126_v52 = vld [vmem:[%s7393_s5 + $0x3d0] sm:$0xf0] }
 0x245   : > { %v4512_v3 = vor.u32 %v5125_v61, %v4511_v57 }
 0x247   : > { %2595 = vmatpush.bf16.msra.mxu0 %v4476_v0  ;;  %2608 = vmatpush.bf16.msra.mxu1 %v4572_v1  ;;  %v4603_v0 = vld [vmem:[%s7393_s5 + $0x470] sm:$0xf]  ;;  %v5147_v1 = vld [vmem:[%s7393_s5 + $0x478] sm:$0xf0] }
 0x248   : > { %2621 = vmatpush.bf16.msrb.mxu2 %v4480_v5  ;;  %2634 = vmatpush.bf16.msrb.mxu3 %v4576_v6  ;;  %v4420_v5 = vor.u32 %v5100_v62, %v4417_v49  ;;  %v4516_v6 = vor.u32 %v5124_v43, %v4513_v63  ;;  %v4604_v7 = vor.u32 %v5147_v1, %v4603_v0  ;;  %v5155_v62 = vld [vmem:[%s7395_s7 + $0x38] sm:$0xff]  ;;  %v5154_v49 = vld [vmem:[%s7395_s7 + $0x30] sm:$0xff] }
 0x249   : > { %v5163_v0 = vld [vmem:[%s7395_s7 + $0x78] sm:$0xff] }
 0x24b   : > { %2596 = vmatpush.bf16.msra.mxu0 %v4464_v10  ;;  %2609 = vmatpush.bf16.msra.mxu1 %v4560_v11  ;;  %v2333_v10 = vrot.slane %v6525_v53, 1  ;;  %v2334_v11 = vrot.slane %v6527_v47, 1  ;;  %v4579_v53 = vld [vmem:[%s7393_s5 + $0x440] sm:$0xf]  ;;  %v5141_v47 = vld [vmem:[%s7393_s5 + $0x448] sm:$0xf0] }
 0x24c   : > { %2622 = vmatpush.bf16.msrb.mxu2 %v4468_v16  ;;  %2635 = vmatpush.bf16.msrb.mxu3 %v4564_v17  ;;  %v4483_v16 = vld [vmem:[%s7393_s5 + $0x380] sm:$0xf]  ;;  %v5117_v17 = vld [vmem:[%s7393_s5 + $0x388] sm:$0xf0]  ;;  %v4580_v23 = vor.u32 %v5141_v47, %v4579_v53  ;;  %v5158_v47 = vld [vmem:[%s7395_s7 + $0x50] sm:$0xff] }
 0x24d   : > { %v4484_v20 = vor.u32 %v5117_v17, %v4483_v16  ;;  %v5149_v53 = vld [vmem:[%s7395_s7 + $0x8] sm:$0xff] }
 0x24f   : > { %2597 = vmatpush.bf16.msra.mxu0 %v4452_v27  ;;  %2610 = vmatpush.bf16.msra.mxu1 %v4548_v28  ;;  %v4472_v27 = vor.u32 %v5114_v25, %v4471_v24  ;;  %v4568_v28 = vor.u32 %v5138_v4, %v4567_v26 }
 0x250   : > { %2623 = vmatpush.bf16.msrb.mxu2 %v4456_v31  ;;  %2636 = vmatpush.bf16.msrb.mxu3 %v4552_v32  ;;  %v4555_v31 = vld [vmem:[%s7393_s5 + $0x410] sm:$0xf]  ;;  %v5135_v32 = vld [vmem:[%s7393_s5 + $0x418] sm:$0xf0] }
 0x251   : > { %v4556_v34 = vor.u32 %v5135_v32, %v4555_v31  ;;  %v5166_v32 = vld [vmem:[%s7395_s7 + $0x90] sm:$0xff] }
 0x253   : > { %2598 = vmatpush.bf16.msra.mxu0 %v4440_v39  ;;  %2611 = vmatpush.bf16.msra.mxu1 %v4536_v40  ;;  %v4448_v39 = vor.u32 %v5108_v36, %v4447_v35  ;;  %v4544_v40 = vor.u32 %v5132_v38, %v4543_v37  ;;  %v5165_v37 = vld [vmem:[%s7395_s7 + $0x88] sm:$0xff] }
 0x254   : > { %2624 = vmatpush.bf16.msrb.mxu2 %v4444_v45  ;;  %2637 = vmatpush.bf16.msrb.mxu3 %v4540_v21  ;;  %v4531_v45 = vld [vmem:[%s7393_s5 + $0x3e0] sm:$0xf]  ;;  %v5129_v21 = vld [vmem:[%s7393_s5 + $0x3e8] sm:$0xf0] }
 0x255   : > { %v4532_v46 = vor.u32 %v5129_v21, %v4531_v45  ;;  %v5164_v21 = vld [vmem:[%s7395_s7 + $0x80] sm:$0xff] }
 0x257   : > { %2599 = vmatpush.bf16.msra.mxu0 %v4428_v55  ;;  %2612 = vmatpush.bf16.msra.mxu1 %v4524_v54  ;;  %v4424_v55 = vor.u32 %v5102_v19, %v4423_v22  ;;  %v4520_v54 = vor.u32 %v5126_v52, %v4519_v51 }
 0x258   : > { %2625 = vmatpush.bf16.msrb.mxu2 %v4432_v58  ;;  %2638 = vmatpush.bf16.msrb.mxu3 %v4528_v60 }
 0x25b   : > { %2600 = vmatpush.bf16.msra.mxu0 %v4416_v2  ;;  %2613 = vmatpush.bf16.msra.mxu1 %v4512_v3  ;;  %v5153_v2 = vld [vmem:[%s7395_s7 + $0x28] sm:$0xff]  ;;  %v5162_v3 = vld [vmem:[%s7395_s7 + $0x70] sm:$0xff] }
 0x25c   : > { %2626 = vmatpush.bf16.msrb.mxu2 %v4420_v5  ;;  %2639 = vmatpush.bf16.msrb.mxu3 %v4516_v6  ;;  %v5152_v5 = vld [vmem:[%s7395_s7 + $0x20] sm:$0xff]  ;;  %v5161_v6 = vld [vmem:[%s7395_s7 + $0x68] sm:$0xff] }
 0x25e   : > { %2601 = vmatmul.bf16.vlgmr.msra.gmra.mxu0 %v2333_v10  ;;  %2614 = vmatmul.bf16.vlgmr.msra.gmra.mxu1 %v2334_v11 }
 0x25f   : > { %2645 = vmatpush.bf16.msrb.mxu0 %v4508_v59  ;;  %2658 = vmatpush.bf16.msrb.mxu1 %v4604_v7 }
 0x260   : > { %2627 = vmatmul.bf16.vlgmr.msrb.gmra.mxu2 %v2333_v10  ;;  %2640 = vmatmul.bf16.vlgmr.msrb.gmra.mxu3 %v2334_v11 }
 0x261   : > { %2854 = vmatpush.bf16.msra.mxu2 %v5155_v62  ;;  %2867 = vmatpush.bf16.msra.mxu3 %v5163_v0 }
 0x263   : > { %2646 = vmatpush.bf16.msrb.mxu0 %v4496_v12  ;;  %2659 = vmatpush.bf16.msrb.mxu1 %v4592_v13  ;;  %v5159_v13 = vld [vmem:[%s7395_s7 + $0x58] sm:$0xff] }
 0x265   : > { %2855 = vmatpush.bf16.msra.mxu2 %v5154_v49  ;;  %2868 = vmatpush.bf16.msra.mxu3 %v5162_v3 }
 0x267   : > { %2647 = vmatpush.bf16.msrb.mxu0 %v4484_v20  ;;  %2660 = vmatpush.bf16.msrb.mxu1 %v4580_v23  ;;  %v5148_v20 = vld [vmem:[%s7395_s7] sm:$0xff]  ;;  %v5157_v23 = vld [vmem:[%s7395_s7 + $0x48] sm:$0xff] }
 0x269   : > { %2856 = vmatpush.bf16.msra.mxu2 %v5153_v2  ;;  %2869 = vmatpush.bf16.msra.mxu3 %v5161_v6 }
 0x26b   : > { %2648 = vmatpush.bf16.msrb.mxu0 %v4472_v27  ;;  %2661 = vmatpush.bf16.msrb.mxu1 %v4568_v28  ;;  %v5156_v27 = vld [vmem:[%s7395_s7 + $0x40] sm:$0xff] }
 0x26d   : > { %2857 = vmatpush.bf16.msra.mxu2 %v5152_v5  ;;  %2870 = vmatpush.bf16.msra.mxu3 %v5160_v9  ;;  %v4745_v9 = vld [vmem:[%s7397_s9 + $0x70] sm:$0xf] }
 0x26f   : > { %2649 = vmatpush.bf16.msrb.mxu0 %v4460_v33  ;;  %2662 = vmatpush.bf16.msrb.mxu1 %v4556_v34  ;;  %v2674_v34 = vld [vmem:[%s7394_s6] sm:$0x7] }
 0x270   : > { %v2678_v2 = vperm.slane %v2674_v34, 2 }
 0x271   : > { %2858 = vmatpush.bf16.msra.mxu2 %v5151_v15  ;;  %2871 = vmatpush.bf16.msra.mxu3 %v5159_v13  ;;  %v5182_v15 = vld [vmem:[%s7397_s9 + $0x74] sm:$0xf]  ;;  %v4739_v13 = vld [vmem:[%s7397_s9 + $0x68] sm:$0xf0] }
 0x273   : > { %2650 = vmatpush.bf16.msrb.mxu0 %v4448_v39  ;;  %2663 = vmatpush.bf16.msrb.mxu1 %v4544_v40  ;;  %v2676_v40 = vperm.slane %v2674_v34, 0 }
 0x275   : > { %2872 = vmatpush.bf16.msra.mxu3 %v5158_v47 }
 0x277   : > { %2651 = vmatpush.bf16.msrb.mxu0 %v4436_v18  ;;  %2664 = vmatpush.bf16.msrb.mxu1 %v4532_v46 }
 0x279   : > { %2873 = vmatpush.bf16.msra.mxu3 %v5157_v23  ;;  %v5178_v23 = vld [vmem:[%s7397_s9 + $0x54] sm:$0xf] }
 0x27b   : > { %2652 = vmatpush.bf16.msrb.mxu0 %v4424_v55  ;;  %2665 = vmatpush.bf16.msrb.mxu1 %v4520_v54  ;;  %v2677_v55 = vperm.slane %v2674_v34, 1 }
 0x27d   : > { %2874 = vmatpush.bf16.msra.mxu3 %v5156_v27 }
 0x27e   : > { %2653 = vmatmul.bf16.vlgmr.msrb.gmra.mxu0 %v2333_v10  ;;  %2666 = vmatmul.bf16.vlgmr.msrb.gmra.mxu1 %v2334_v11  ;;  %v5150_v10 = vld [vmem:[%s7395_s7 + $0x10] sm:$0xff] }
 0x27f   : > { %2859 = vmatpush.bf16.msra.mxu2 %v5150_v10  ;;  %2884 = vmatpush.bf16.msra.mxu0 %v5167_v30  ;;  %v5176_v30 = vld [vmem:[%s7397_s9 + $0x44] sm:$0xf] }
 0x283   : > { %2860 = vmatpush.bf16.msra.mxu2 %v5149_v53  ;;  %2885 = vmatpush.bf16.msra.mxu0 %v5166_v32  ;;  %v5181_v53 = vld [vmem:[%s7397_s9 + $0x64] sm:$0xf0]  ;;  %v4721_v32 = vld [vmem:[%s7397_s9 + $0x40] sm:$0xf] }
 0x287   : > { %2861 = vmatpush.bf16.msra.mxu2 %v5148_v20  ;;  %2886 = vmatpush.bf16.msra.mxu0 %v5165_v37  ;;  %v4715_v37 = vld [vmem:[%s7397_s9 + $0x38] sm:$0xf0] }
 0x28b   : > { %2887 = vmatpush.bf16.msra.mxu0 %v5164_v21  ;;  %v4707_v21 = vld [vmem:[%s7397_s9 + $0x28] sm:$0xf0] }
 0x29a   : > { %v1863_v48 = vpop.f32.mrf.mxu0  ;;  %v1876_v56 = vpop.f32.mrf.mxu1 }
 0x29b   : > { %v1877_v31 = vadd.f32 %v1876_v56, %v1863_v48 }
 0x2a1   : > { %v7031_v57 = vpop.f32.mrf.mxu2  ;;  %v7033_v58 = vpop.f32.mrf.mxu3 }
 0x2a2   : > { %v1865_v60 = vpop.f32.mrf.mxu0  ;;  %v1878_v61 = vpop.f32.mrf.mxu1  ;;  %v1903_v41 = vadd.f32 %v7033_v58, %v7031_v57 }
 0x2a9   : > { %v1891_v43 = vpop.f32.mrf.mxu2  ;;  %v1904_v63 = vpop.f32.mrf.mxu3 }
 0x2aa   : > { %v1915_v50 = vpop.f32.mrf.mxu0  ;;  %v1928_v44 = vpop.f32.mrf.mxu1 }
 0x2ab   : > { %v7044_v1 = vadd.f32 %v1928_v44, %v1915_v50 }
 0x2b1   : > { %v2199_v59 = vpop.f32.mrf.mxu2  ;;  %v2212_v7 = vpop.f32.mrf.mxu3 }
 0x2b2   : > { %v1917_v8 = vpop.f32.mrf.mxu0  ;;  %v1930_v14 = vpop.f32.mrf.mxu1  ;;  %v2200_v33 = vadd.f32 %v2199_v59, %v1877_v31  ;;  %v4723_v31 = vld [vmem:[%s7397_s9 + $0x48] sm:$0xf0] }
 0x2b3   : > { %v4726_v34 = vor.u32 %v5176_v30, %v4723_v31 }
 0x2b4   : > { %v2213_v38 = vadd.f32 %v2212_v7, %v2200_v33  ;;  %v5177_v33 = vld [vmem:[%s7397_s9 + $0x44] sm:$0xf0] }
 0x2b9   : > { %v2201_v11 = vpop.f32.mrf.mxu2  ;;  %v2214_v12 = vpop.f32.mrf.mxu3 }
 0x2ba   : > { %v5183_v11 = vld [vmem:[%s7397_s9 + $0x74] sm:$0xf0]  ;;  %v5180_v12 = vld [vmem:[%s7397_s9 + $0x64] sm:$0xf] }
 0x2bb   : > { %v2225_v16 = vpop.f32.mrf.mxu0  ;;  %v2238_v17 = vpop.f32.mrf.mxu1  ;;  %v4742_v47 = vor.u32 %v5180_v12, %v4739_v13  ;;  %v4813_v12 = vld [vmem:[%s7397_s9 + $0xd8] sm:$0xf0]  ;;  %v4811_v13 = vld [vmem:[%s7397_s9 + $0xd0] sm:$0xf] }
 0x2bc   : > { %v2226_v45 = vadd.f32 %v2225_v16, %v1903_v41  ;;  %v4746_v16 = vor.u32 %v5183_v11, %v4745_v9  ;;  %v5194_v11 = vld [vmem:[%s7397_s9 + $0xd4] sm:$0xf] }
 0x2be   : > { %v2239_v51 = vadd.f32 %v2238_v17, %v2226_v45  ;;  %v4737_v17 = vld [vmem:[%s7397_s9 + $0x60] sm:$0xf]  ;;  %3018 = vmatpush.bf16.msrb.mxu2 %v4746_v16  ;;  %v5172_v45 = vld [vmem:[%s7397_s9 + $0x24] sm:$0xf]  ;;  %v5195_v16 = vld [vmem:[%s7397_s9 + $0xd4] sm:$0xf0] }
 0x2bf   : > { %v4738_v20 = vor.u32 %v5181_v53, %v4737_v17  ;;  %v4816_v17 = vor.u32 %v5194_v11, %v4813_v12  ;;  %v4812_v53 = vor.u32 %v5195_v16, %v4811_v13 }
 0x2c2   : > { %3019 = vmatpush.bf16.msrb.mxu2 %v4738_v20  ;;  %v4805_v20 = vld [vmem:[%s7397_s9 + $0xc8] sm:$0xf0] }
 0x2c3   : > { %v2227_v26 = vpop.f32.mrf.mxu0  ;;  %v2240_v4 = vpop.f32.mrf.mxu1 }
 0x2c4   : > { %v2251_v24 = vpop.f32.mrf.mxu2  ;;  %v2264_v25 = vpop.f32.mrf.mxu3  ;;  %v4729_v26 = vld [vmem:[%s7397_s9 + $0x50] sm:$0xf]  ;;  %v5179_v4 = vld [vmem:[%s7397_s9 + $0x54] sm:$0xf0] }
 0x2c5   : > { %v2252_v43 = vadd.f32 %v2251_v24, %v7044_v1  ;;  %v4747_v1 = vld [vmem:[%s7397_s9 + $0x78] sm:$0xf0] }
 0x2c6   : > { %v4750_v10 = vor.u32 %v5182_v15, %v4747_v1  ;;  %v4731_v24 = vld [vmem:[%s7397_s9 + $0x58] sm:$0xf0]  ;;  %v4751_v15 = vld [vmem:[%s7396_s8 + $0x1] sm:$0x1] }
 0x2c7   : > { %v2265_v44 = vadd.f32 %v2264_v25, %v2252_v43  ;;  %v5199_v43 = vld [vmem:[%s7397_s9 + $0xf4] sm:$0xf0] }
 0x2c8   : > { %3031 = vmatpush.bf16.msrb.mxu3 %v4750_v10 }
 0x2cc   : > { %v2253_v28 = vpop.f32.mrf.mxu2  ;;  %v2266_v29 = vpop.f32.mrf.mxu3  ;;  %3032 = vmatpush.bf16.msrb.mxu3 %v4742_v47  ;;  %v5192_v47 = vld [vmem:[%s7397_s9 + $0xc4] sm:$0xf] }
 0x2cd   : > { %v4734_v28 = vor.u32 %v5178_v23, %v4731_v24  ;;  %v4730_v29 = vor.u32 %v5179_v4, %v4729_v26  ;;  %v4803_v23 = vld [vmem:[%s7397_s9 + $0xc0] sm:$0xf]  ;;  %v5193_v24 = vld [vmem:[%s7397_s9 + $0xc4] sm:$0xf0]  ;;  %v5190_v4 = vld [vmem:[%s7397_s9 + $0xb4] sm:$0xf] }
 0x2ce   : > { %v4804_v26 = vor.u32 %v5193_v24, %v4803_v23 }
 0x2cf   : > { %3020 = vmatpush.bf16.msrb.mxu2 %v4730_v29  ;;  %v5191_v29 = vld [vmem:[%s7397_s9 + $0xb4] sm:$0xf0] }
 0x2d0   : > { %3033 = vmatpush.bf16.msrb.mxu3 %v4734_v28  ;;  %v4795_v28 = vld [vmem:[%s7397_s9 + $0xb0] sm:$0xf] }
 0x2d1   : > { %v4796_v31 = vor.u32 %v5191_v29, %v4795_v28 }
 0x2d4   : > { %3034 = vmatpush.bf16.msrb.mxu3 %v4726_v34  ;;  %v4787_v34 = vld [vmem:[%s7397_s9 + $0xa0] sm:$0xf] }
 0x2db   : > { %v2602_v35 = vpop.f32.mrf.mxu0  ;;  %v2615_v36 = vpop.f32.mrf.mxu1 }
 0x2dc   : > { %v2616_v39 = vadd.f32 %v2615_v36, %v2602_v35  ;;  %v4722_v35 = vor.u32 %v5177_v33, %v4721_v32  ;;  %v5174_v36 = vld [vmem:[%s7397_s9 + $0x34] sm:$0xf]  ;;  %v5188_v32 = vld [vmem:[%s7397_s9 + $0xa4] sm:$0xf]  ;;  %v4789_v33 = vld [vmem:[%s7397_s9 + $0xa8] sm:$0xf0] }
 0x2dd   : > { %v4718_v41 = vor.u32 %v5174_v36, %v4715_v37  ;;  %v5189_v36 = vld [vmem:[%s7397_s9 + $0xa4] sm:$0xf0] }
 0x2de   : > { %v2671_v42 = vadd.f32 %v2616_v39, %v2213_v38  ;;  %v4713_v39 = vld [vmem:[%s7397_s9 + $0x30] sm:$0xf]  ;;  %3021 = vmatpush.bf16.msrb.mxu2 %v4722_v35  ;;  %v4792_v35 = vor.u32 %v5188_v32, %v4789_v33  ;;  %v4788_v37 = vor.u32 %v5189_v36, %v4787_v34  ;;  %v3239_v34 = vld [vmem:[%s7400_s12] sm:$0x1] }
 0x2df   : > { %3035 = vmatpush.bf16.msrb.mxu3 %v4718_v41 }
 0x2e0   : > { %v2682_v18 = vadd.f32 %v2676_v40, %v2671_v42  ;;  %v5175_v40 = vld [vmem:[%s7397_s9 + $0x34] sm:$0xf0] }
 0x2e1   : > { %v4714_v42 = vor.u32 %v5175_v40, %v4713_v39  ;;  %v4781_v39 = vld [vmem:[%s7397_s9 + $0x98] sm:$0xf0]  ;;  %v4779_v40 = vld [vmem:[%s7397_s9 + $0x90] sm:$0xf] }
 0x2e2   : > { %v2685_v46 = vmax.f32 %v2682_v18, 0.0  ;;  %v4705_v18 = vld [vmem:[%s7397_s9 + $0x20] sm:$0xf] }
 0x2e3   : > { %v2628_v22 = vpop.f32.mrf.mxu2  ;;  %v2641_v19 = vpop.f32.mrf.mxu3  ;;  %3022 = vmatpush.bf16.msrb.mxu2 %v4714_v42  ;;  %v5187_v42 = vld [vmem:[%s7397_s9 + $0x94] sm:$0xf0] }
 0x2e4   : > { %v2642_v52 = vadd.f32 %v2641_v19, %v2628_v22  ;;  %v2604_v54 = vpop.f32.mrf.mxu0  ;;  %v2617_v48 = vpop.f32.mrf.mxu1  ;;  %v2688_v56 = vpack.c.bf16 %v2685_v46, %v2685_v46  ;;  %v5173_v46 = vld [vmem:[%s7397_s9 + $0x24] sm:$0xf0]  ;;  %v4710_v22 = vor.u32 %v5172_v45, %v4707_v21  ;;  %v4780_v45 = vor.u32 %v5187_v42, %v4779_v40  ;;  %v5168_v21 = vld [vmem:[%s7397_s9 + $0x4] sm:$0xf] }
 0x2e5   : > { %v4706_v19 = vor.u32 %v5173_v46, %v4705_v18  ;;  %v5320_v54 = vmov 65535   ;;  %v4691_v18 = vld [vmem:[%s7397_s9 + $0x8] sm:$0xf0]  ;;  %v4689_v46 = vld [vmem:[%s7397_s9] sm:$0xf] }
 0x2e6   : > { %v2672_v60 = vadd.f32 %v2642_v52, %v2239_v51  ;;  %2862 = vmatmul.bf16.vlgmr.msra.gmra.mxu2 %v2688_v56  ;;  %v5170_v51 = vld [vmem:[%s7397_s9 + $0x14] sm:$0xf]  ;;  %v4699_v52 = vld [vmem:[%s7397_s9 + $0x18] sm:$0xf0]  ;;  %v2903_v48 = vsel %vm2901_vm3, 4294967295, %v5320_v54  ;;  %3036 = vmatpush.bf16.msrb.mxu3 %v4710_v22  ;;  %v4694_v22 = vor.u32 %v5168_v21, %v4691_v18 }
 0x2e7   : > { %v4697_v56 = vld [vmem:[%s7397_s9 + $0x10] sm:$0xf]  ;;  %3023 = vmatpush.bf16.msrb.mxu2 %v4706_v19  ;;  %v5169_v19 = vld [vmem:[%s7397_s9 + $0x4] sm:$0xf0] }
 0x2e8   : > { %v2683_v57 = vadd.f32 %v2677_v55, %v2672_v60  ;;  %v5171_v60 = vld [vmem:[%s7397_s9 + $0x14] sm:$0xf0] }
 0x2ea   : > { %v2686_v58 = vmax.f32 %v2683_v57, 0.0 }
 0x2eb   : > { %v2630_v61 = vpop.f32.mrf.mxu2  ;;  %v2643_v62 = vpop.f32.mrf.mxu3 }
 0x2ec   : > { %v2689_v49 = vpack.c.bf16 %v2686_v58, %v2686_v58  ;;  %v5198_v58 = vld [vmem:[%s7397_s9 + $0xf4] sm:$0xf]  ;;  %v4829_v62 = vld [vmem:[%s7397_s9 + $0xf8] sm:$0xf0] }
 0x2ee   : > { %2875 = vmatmul.bf16.vlgmr.msra.gmra.mxu3 %v2689_v49  ;;  %v4827_v49 = vld [vmem:[%s7397_s9 + $0xf0] sm:$0xf] }
 0x2fb   : > { %v2654_v63 = vpop.f32.mrf.mxu0  ;;  %v2667_v50 = vpop.f32.mrf.mxu1 }
 0x2fc   : > { %v2668_v0 = vadd.f32 %v2667_v50, %v2654_v63  ;;  %v4702_v63 = vor.u32 %v5170_v51, %v4699_v52  ;;  %v2904_v50 = vsel %vm2902_vm4, %v2903_v48, 0  ;;  %v5184_v51 = vld [vmem:[%s7397_s9 + $0x84] sm:$0xf]  ;;  %v4773_v52 = vld [vmem:[%s7397_s9 + $0x88] sm:$0xf0] }
 0x2fd   : > { %v4776_v54 = vor.u32 %v5184_v51, %v4773_v52  ;;  %v4771_v48 = vld [vmem:[%s7397_s9 + $0x80] sm:$0xf] }
 0x2fe   : > { %v2673_v3 = vadd.f32 %v2668_v0, %v2265_v44  ;;  %v4698_v44 = vor.u32 %v5171_v60, %v4697_v56  ;;  %3037 = vmatpush.bf16.msrb.mxu3 %v4702_v63  ;;  %v5185_v56 = vld [vmem:[%s7397_s9 + $0x84] sm:$0xf0]  ;;  %v5204_v63 = vld [vmem:[%s7399_s11 + $0x20] sm:$0xff] }
 0x2ff   : > { %v4772_v60 = vor.u32 %v5185_v56, %v4771_v48 }
 0x300   : > { %v2684_v5 = vadd.f32 %v2678_v2, %v2673_v3  ;;  %v4832_v2 = vor.u32 %v5198_v58, %v4829_v62  ;;  %v4828_v3 = vor.u32 %v5199_v43, %v4827_v49  ;;  %3024 = vmatpush.bf16.msrb.mxu2 %v4698_v44  ;;  %v5215_v58 = vld [vmem:[%s7399_s11 + $0x78] sm:$0xff]  ;;  %v5214_v62 = vld [vmem:[%s7399_s11 + $0x70] sm:$0xff]  ;;  %v5205_v49 = vld [vmem:[%s7399_s11 + $0x28] sm:$0xff] }
 0x301   : > { %v5213_v43 = vld [vmem:[%s7399_s11 + $0x68] sm:$0xff]  ;;  %v5203_v44 = vld [vmem:[%s7399_s11 + $0x18] sm:$0xff] }
 0x302   : > { %v2687_v6 = vmax.f32 %v2684_v5, 0.0  ;;  %v5196_v5 = vld [vmem:[%s7397_s9 + $0xe4] sm:$0xf]  ;;  %3038 = vmatpush.bf16.msrb.mxu3 %v4694_v22 }
 0x303   : > { %v2656_v59 = vpop.f32.mrf.mxu0  ;;  %v2669_v7 = vpop.f32.mrf.mxu1 }
 0x304   : > { %v2690_v8 = vpack.c.bf16 %v2687_v6, %v2687_v6  ;;  %v4821_v59 = vld [vmem:[%s7397_s9 + $0xe8] sm:$0xf0]  ;;  %v4819_v7 = vld [vmem:[%s7397_s9 + $0xe0] sm:$0xf] }
 0x305   : > { %v4824_v9 = vor.u32 %v5196_v5, %v4821_v59 }
 0x306   : > { %4685 = vmatmul.msk.bf16.vlgmr.msra.gmra.mxu0 %vm562_vm0, %v2690_v8  ;;  %v5197_v8 = vld [vmem:[%s7397_s9 + $0xe4] sm:$0xf0]  ;;  %3349 = vmatpush.bf16.msra.mxu3 %v5215_v58 }
 0x307   : > { %v4820_v10 = vor.u32 %v5197_v8, %v4819_v7  ;;  %v5202_v8 = vld [vmem:[%s7399_s11 + $0x10] sm:$0xff] }
 0x30a   : > { %3350 = vmatpush.bf16.msra.mxu3 %v5214_v62 }
 0x30e   : > { %3351 = vmatpush.bf16.msra.mxu3 %v5213_v43 }
 0x369   : > { %v2863_v14 = vpop.f32.mrf.mxu2 }
 0x371   : > { %v2876_v25 = vpop.f32.mrf.mxu3  ;;  %v2865_v27 = vpop.f32.mrf.mxu2 }
 0x372   : > { %v2877_v55 = vadd.f32 %v2876_v25, %v2863_v14  ;;  %v2896_v14 = vld [vmem:[%s7396_s8] sm:$0x1]  ;;  %v4808_v25 = vor.u32 %v5192_v47, %v4805_v20  ;;  %v4797_v27 = vld [vmem:[%s7397_s9 + $0xb8] sm:$0xf0] }
 0x373   : > { %v4800_v30 = vor.u32 %v5190_v4, %v4797_v27 }
 0x379   : > { %v2878_v38 = vpop.f32.mrf.mxu3 }
 0x37a   : > { %v5186_v38 = vld [vmem:[%s7397_s9 + $0x94] sm:$0xf] }
 0x37b   : > { %v4784_v41 = vor.u32 %v5186_v38, %v4781_v39 }
 0x383   : > { %v2889_v57 = vpop.f32.mrf.mxu0 }
 0x384   : > { %v2890_v61 = vadd.f32 %v2889_v57, %v2877_v55  ;;  %v4690_v55 = vor.u32 %v5169_v19, %v4689_v46  ;;  %v5207_v57 = vld [vmem:[%s7399_s11 + $0x38] sm:$0xff] }
 0x386   : > { %v2893_v0 = vpack.c.bf16 %v2890_v61, %v2890_v61  ;;  %3025 = vmatpush.bf16.msrb.mxu2 %v4690_v55  ;;  %v5206_v61 = vld [vmem:[%s7399_s11 + $0x30] sm:$0xff] }
 0x388   : > { %v2906_v6 = vand.u32 %v2904_v50, %v2893_v0  ;;  %v5212_v50 = vld [vmem:[%s7399_s11 + $0x60] sm:$0xff]  ;;  %v5211_v0 = vld [vmem:[%s7399_s11 + $0x58] sm:$0xff] }
 0x389   : > { %3352 = vmatpush.bf16.msra.mxu3 %v5212_v50 }
 0x38a   : > { %2915 = vmatpush.bf16.msra.mxu1 %v2906_v6  ;;  %3063 = vmatpush.bf16.msrb.mxu0 %v2906_v6 }
 0x38b   : > { %v2891_v1 = vpop.f32.mrf.mxu0  ;;  %3336 = vmatpush.bf16.msra.mxu2 %v5207_v57 }
 0x38c   : > { %v5209_v1 = vld [vmem:[%s7399_s11 + $0x48] sm:$0xff] }
 0x38d   : > { %4686 = vmatmul.msk.bf16.vlgmr.msra.gmra.mxu1 %vm2897_vm5, %v2896_v14  ;;  %4752 = vmatmul.msk.bf16.vlgmr.msrb.gmra.mxu0 %vm2897_vm5, %v4751_v15  ;;  %v5210_v14 = vld [vmem:[%s7399_s11 + $0x50] sm:$0xff]  ;;  %v5201_v15 = vld [vmem:[%s7399_s11 + $0x8] sm:$0xff] }
 0x38e   : > { %3180 = vmatpush.bf16.msra.mxu0 %v4832_v2  ;;  %3167 = vmatpush.bf16.msrb.mxu1 %v4828_v3 }
 0x38f   : > { %3337 = vmatpush.bf16.msra.mxu2 %v5206_v61  ;;  %3353 = vmatpush.bf16.msra.mxu3 %v5211_v0 }
 0x392   : > { %3181 = vmatpush.bf16.msra.mxu0 %v4824_v9  ;;  %3168 = vmatpush.bf16.msrb.mxu1 %v4820_v10  ;;  %v5200_v9 = vld [vmem:[%s7399_s11] sm:$0xff] }
 0x393   : > { %3338 = vmatpush.bf16.msra.mxu2 %v5205_v49  ;;  %3354 = vmatpush.bf16.msra.mxu3 %v5210_v14  ;;  %v5208_v10 = vld [vmem:[%s7399_s11 + $0x40] sm:$0xff] }
 0x396   : > { %3182 = vmatpush.bf16.msra.mxu0 %v4816_v17  ;;  %3169 = vmatpush.bf16.msrb.mxu1 %v4812_v53  ;;  %v2894_v53 = vld [vmem:[%s7398_s10] sm:$0x3] }
 0x397   : > { %3339 = vmatpush.bf16.msra.mxu2 %v5204_v63  ;;  %3355 = vmatpush.bf16.msra.mxu3 %v5209_v1 }
 0x39a   : > { %3183 = vmatpush.bf16.msra.mxu0 %v4808_v25  ;;  %3170 = vmatpush.bf16.msrb.mxu1 %v4804_v26 }
 0x39b   : > { %3340 = vmatpush.bf16.msra.mxu2 %v5203_v44  ;;  %3356 = vmatpush.bf16.msra.mxu3 %v5208_v10 }
 0x39e   : > { %3184 = vmatpush.bf16.msra.mxu0 %v4800_v30  ;;  %3171 = vmatpush.bf16.msrb.mxu1 %v4796_v31 }
 0x39f   : > { %3341 = vmatpush.bf16.msra.mxu2 %v5202_v8 }
 0x3a2   : > { %3185 = vmatpush.bf16.msra.mxu0 %v4792_v35  ;;  %3172 = vmatpush.bf16.msrb.mxu1 %v4788_v37 }
 0x3a3   : > { %3342 = vmatpush.bf16.msra.mxu2 %v5201_v15 }
 0x3a6   : > { %3186 = vmatpush.bf16.msra.mxu0 %v4784_v41  ;;  %3173 = vmatpush.bf16.msrb.mxu1 %v4780_v45 }
 0x3a7   : > { %3343 = vmatpush.bf16.msra.mxu2 %v5200_v9 }
 0x3aa   : > { %3187 = vmatpush.bf16.msra.mxu0 %v4776_v54  ;;  %3174 = vmatpush.bf16.msrb.mxu1 %v4772_v60 }
 0x40a   : > { %v2917_v2 = vpop.f32.mrf.mxu1  ;;  %v3065_v3 = vpop.f32.mrf.mxu0 }
 0x40b   : > { %v2921_v5 = vpack.c.bf16 %v2917_v2, %v2917_v2  ;;  %v3069_v6 = vpack.c.bf16 %v3065_v3, %v3065_v3 }
 0x40d   : > { %3039 = vmatmul.bf16.vlgmr.msrb.gmra.mxu3 %v2921_v5  ;;  %3026 = vmatmul.bf16.vlgmr.msrb.gmra.mxu2 %v2921_v5 }
 0x40e   : > { %3188 = vmatmul.bf16.vlgmr.msra.gmra.mxu0 %v3069_v6  ;;  %3175 = vmatmul.bf16.vlgmr.msrb.gmra.mxu1 %v3069_v6 }
 0x412   : > { %v2919_v59 = vpop.f32.mrf.mxu1  ;;  %v3067_v7 = vpop.f32.mrf.mxu0 }
 0x48b   : > { %v3189_v11 = vpop.f32.mrf.mxu0  ;;  %v3176_v12 = vpop.f32.mrf.mxu1 }
 0x48c   : > { %v3195_v47 = vrot.slane %v3189_v11, 7 }
 0x48e   : > { %v3196_v26 = vsel %vm3047_vm6, %v3176_v12, %v3195_v47 }
 0x490   : > { %v3040_v13 = vpop.f32.mrf.mxu3  ;;  %v3027_v16 = vpop.f32.mrf.mxu2 }
 0x491   : > { %v3046_v17 = vrot.slane %v3040_v13, 7 }
 0x493   : > { %v3048_v20 = vsel %vm3047_vm6, %v3027_v16, %v3046_v17  ;;  %v3178_v23 = vpop.f32.mrf.mxu1  ;;  %v3191_v24 = vpop.f32.mrf.mxu0 }
 0x494   : > { %v3050_v25 = vadd.f32 %v3048_v20, %v2894_v53 }
 0x496   : > { %v3198_v4 = vadd.f32 %v3196_v26, %v3050_v25 }
 0x498   : > { %v3199_v27 = vmax.f32 %v3198_v4, 0.0  ;;  %v3029_v28 = vpop.f32.mrf.mxu2  ;;  %v3042_v29 = vpop.f32.mrf.mxu3 }
 0x49a   : > { %v3201_v30 = vperm.slane %v3199_v27, 0  ;;  %v3202_v31 = vperm.slane %v3199_v27, 1 }
 0x49c   : > { %v3205_v32 = vpack.c.bf16 %v3201_v30, %v3201_v30  ;;  %v3206_v33 = vpack.c.bf16 %v3202_v31, %v3202_v31 }
 0x49e   : > { %3344 = vmatmul.bf16.vlgmr.msra.gmra.mxu2 %v3205_v32  ;;  %3357 = vmatmul.bf16.vlgmr.msra.gmra.mxu3 %v3206_v33 }
 0x521   : > { %v3345_v35 = vpop.f32.mrf.mxu2  ;;  %v3358_v36 = vpop.f32.mrf.mxu3 }
 0x522   : > { %v3346_v37 = vadd.f32 %v3345_v35, %v3239_v34 }
 0x524   : > { %v3359_v38 = vadd.f32 %v3358_v36, %v3346_v37 }
 0x526   : > { %3362 = vst [vmem:[%s432_s16] sm:$0x1] %v3359_v38 }
 0x527   : > { %5283 = shalt.err (!%p5280_p3)
}
 0x528   : > { %5216 = dma.vmem_to_hbm [thread:$0]  (%p5429_p5), %s3375_s21, 16, %s3377_s20, %s3364_s22  }
 0x529   : > { %v3347_v39 = vpop.f32.mrf.mxu2  ;;  %v3360_v40 = vpop.f32.mrf.mxu3 }
 0x52a PF: > { %p5222_p4 = scmp.ge.s32.totalorder %s5318_s28, 2  ;;  %s3388_s17 = sand.u32 1, %s5306_s25  }
 0x52b   : > { %s3389_s16 = scalar_lea.sflag [#allocation3], %s3388_s17 }
 0x52c   : > { %p5219_p7 = pnand %p5222_p4, %p5433_p6 }
 0x52e   : > { %p5220_p8 = pneg %p5219_p7 }
 0x530   : > { %5301 = dma.done.wait (%p5220_p8), %s3389_s16, 16  }
 0x531   : > { %5303 = vsyncadd (%p5220_p8), %s3389_s16, 4294967280  ;;  %s7413_s28 = sld [smem:[#allocation6_spill]]  ;;  %s7416_s25 = smov %s5310_s26 }
 0x532   : > { %s7414_s24 = sld [smem:[#allocation5_spill]] }
 0x533   : > { %s7415_s27 = sld [smem:[#allocation7_spill]] }
 0x537   : > { %p23_p5 = scmp.ge.s32.totalorder %s7413_s28, 4  }
 0x538   : > { %s7417_s26 = smov %s7414_s24 }
 0x539   :  { %25 = sbr.rel (!%p23_p5) target bundleno = 3 (0x3), region = 113 }
 0x53e   :  { %3394 = vsyncpa [#allocation3], 1 }
 0x53f   :  { %3396 = vsyncpa [#allocation3 + $0x1], 1 }

</bundles_post_ra>
